<compile_context>
chip_gen: v7x
topology: tpu7x:2x2x1
jax: 0.10.0
libtpu: 0.0.40
codegen_flags: <defaults>
</compile_context>

<pallas_src>
import functools

import jax
import jax.numpy as jnp
from jax.experimental import pallas as pl
from jax.experimental.pallas import tpu as pltpu

# ----------------------------- configuration --------------------------------
NUM_LAYERS = 2          # the wavefront kernel is written for exactly 2 layers
BATCH = 2
SEQ_LEN = 8             # must be >= 2 (tail step reuses the t=T-1 bias slot)
INPUT_SIZE = 16
HIDDEN1 = 32
HIDDEN2 = 32
HIDDEN3 = 16
NUM_CLASSES = 4
DROPOUT_PROB = 0.0      # inference -> identity
LANE = 128              # lane-dense padded output width for fc3


# ------------------------------- kernel -------------------------------------
def lstm_mlp_kernel(
    x_ref,                       # (T*B, I)   time-major, flattened
    w_in_ref,                    # (I, 8H)    packed+scaled layer-0 input weights
    b_in_ref,                    # (1, 8H)    packed+scaled biases (b0 | b1)
    w_rec_ref,                   # (2H, 8H)   fused recurrent weights (both layers)
    fc1_w_ref, fc1_b_ref,        # (H1, H2), (1, H2)
    fc2_w_ref, fc2_b_ref,        # (H2, H3), (1, H3)
    fc3_w_ref, fc3_b_ref,        # (H3, LANE) zero-padded, (1, LANE)
    out_ref,                     # (L*B, LANE)
    gx_ref,                      # scratch: (T, B, 8H) VMEM
    *, seq_len, batch, hidden,
):
    T, B, H = seq_len, batch, hidden

    # --- off the serial path: one batched input projection for ALL timesteps.
    # Layer-1 columns of w_in are zero, so gx[t] layer-1 half == scaled b1.
    gx_all = jnp.dot(x_ref[...], w_in_ref[...],
                     preferred_element_type=jnp.float32) + b_in_ref[...]

    lane = jax.lax.broadcasted_iota(jnp.int32, (1, 8 * H), 1)
    l0_cols = (lane & (2 * H - 1)) < H        # layer-0 sub-columns of each gate block
    for t in range(T):
        blk = gx_all[t * B:(t + 1) * B, :]
        if t == 0:
            # Zero the layer-1 preactivations of the very first wavefront step:
            # tanh(0)=0 makes the spurious layer-1 "t=-1" cell update an exact
            # no-op (c1=h1=0), so no per-step masking is needed in the loop.
            blk = jnp.where(l0_cols, blk, 0.0)
        gx_ref[t] = blk

    w_rec = w_rec_ref[...]
    hcat = jnp.zeros((B, 2 * H), jnp.float32)   # lanes [h0 | h1]
    c_cat = jnp.zeros((B, 2 * H), jnp.float32)  # lanes [c0 | c1]
    h0_last = None

    # --- wavefront recurrence: step s -> layer-0 cell t=s, layer-1 cell t=s-1.
    # T+1 = 9 fully-unrolled steps (vs 16 dependent cells in the naive order).
    for s in range(T + 1):
        gx_s = gx_ref[min(s, T - 1)]            # (B, 8H); tail reuses the b1 columns
        if s == 0:
            g = gx_s                            # h == 0 -> recurrent matmul is zero
        else:
            g = gx_s + jnp.dot(hcat, w_rec, preferred_element_type=jnp.float32)
        act = jnp.tanh(g)                       # ONE EUP launch for all gates,
        #                                         i/f/o columns were pre-scaled by 0.5
        i_g = 0.5 + 0.5 * act[:, 0 * 2 * H:1 * 2 * H]   # sigmoid(z) = 0.5+0.5*tanh(z/2)
        f_g = 0.5 + 0.5 * act[:, 1 * 2 * H:2 * 2 * H]
        g_g =             act[:, 2 * 2 * H:3 * 2 * H]   # tanh(z)
        o_g = 0.5 + 0.5 * act[:, 3 * 2 * H:4 * 2 * H]
        c_cat = f_g * c_cat + i_g * g_g
        hcat = o_g * jnp.tanh(c_cat)            # second (and last) EUP launch
        if s == T - 1:
            h0_last = hcat[:, :H]               # layer-0 final hidden state (t=T-1)
        # at s == T the layer-0 half computes a discarded extra cell; only the
        # layer-1 half (cell t=T-1) is kept below.
    h1_last = hcat[:, H:2 * H]                  # layer-1 final hidden state (t=T-1)

    # hn.view(-1, H1): layer-major row order (layer-0 batch rows, then layer-1)
    hn = jnp.concatenate([h0_last, h1_last], axis=0)    # (L*B, H)

    # MLP head (dropout = identity in inference).
    # TODO(synk): training-mode dropout (LSTM inter-layer + MLP) not implemented.
    out = jnp.maximum(hn, 0.0)
    out = jnp.maximum(
        jnp.dot(out, fc1_w_ref[...], preferred_element_type=jnp.float32)
        + fc1_b_ref[...], 0.0)
    out = jnp.maximum(
        jnp.dot(out, fc2_w_ref[...], preferred_element_type=jnp.float32)
        + fc2_b_ref[...], 0.0)
    out = (jnp.dot(out, fc3_w_ref[...], preferred_element_type=jnp.float32)
           + fc3_b_ref[...])
    out_ref[...] = out.astype(out_ref.dtype)    # (L*B, 128) lane-dense store


# ------------------------ one-time parameter packing -------------------------
def prepare_params(params):
    """Run ONCE (outside the per-call path). Packs the LSTM weights into the
    fused/interleaved layout the kernel consumes and pre-pads the fc3 head."""
    H, I = HIDDEN1, INPUT_SIZE
    # Gate blocks are [i, f, g, o]; i/f/o are pre-scaled by 0.5 so sigmoid can
    # be evaluated as 0.5 + 0.5*tanh(.) with a single tanh launch in-kernel.
    gate_scale = jnp.repeat(jnp.array([0.5, 0.5, 1.0, 0.5], jnp.float32), 2 * H)

    def split_gates(w):                       # torch (4H, in) -> (in, 4, H)
        return jnp.transpose(w).reshape(-1, 4, H)

    # Input projection: layer-0 W_ih scattered into the layer-0 sub-columns of
    # each gate block; layer-1 sub-columns stay zero (they carry only b1).
    w_in = jnp.zeros((I, 4, 2, H), jnp.float32)
    w_in = w_in.at[:, :, 0, :].set(split_gates(params["w_ih_l0"]))
    w_in = w_in.reshape(I, 8 * H) * gate_scale

    b0 = params["b_ih_l0"] + params["b_hh_l0"]
    b1 = params["b_ih_l1"] + params["b_hh_l1"]
    b_in = jnp.zeros((4, 2, H), jnp.float32)
    b_in = b_in.at[:, 0, :].set(b0.reshape(4, H))
    b_in = b_in.at[:, 1, :].set(b1.reshape(4, H))
    b_in = (b_in.reshape(8 * H) * gate_scale)[None, :]

    # Fused recurrent weights: rows 0:H multiply h0_{t-1}, rows H:2H multiply
    # h1_{t-2}; columns interleave layers inside each gate block.
    w_rec = jnp.zeros((2 * H, 4, 2, H), jnp.float32)
    w_rec = w_rec.at[0:H, :, 0, :].set(split_gates(params["w_hh_l0"]))
    w_rec = w_rec.at[0:H, :, 1, :].set(split_gates(params["w_ih_l1"]))
    w_rec = w_rec.at[H:2 * H, :, 1, :].set(split_gates(params["w_hh_l1"]))
    w_rec = w_rec.reshape(2 * H, 8 * H) * gate_scale

    # fc3 zero-padded to 128 lanes so the kernel's final store is lane-dense.
    fc3_w = jnp.pad(jnp.transpose(params["fc3_w"]),
                    ((0, 0), (0, LANE - NUM_CLASSES)))
    fc3_b = jnp.pad(params["fc3_b"], (0, LANE - NUM_CLASSES))[None, :]

    return (
        w_in, b_in, w_rec,
        jnp.transpose(params["fc1_w"]), params["fc1_b"][None, :],
        jnp.transpose(params["fc2_w"]), params["fc2_b"][None, :],
        fc3_w, fc3_b,
    )


# ------------------------------ wrapper --------------------------------------
@jax.jit
def lstm_1_forward(x, packed):
    """x: (B, T, I) float32 (batch-first, like the PyTorch module).
    `packed` comes from prepare_params() (computed once, not per call)."""
    B, T, I = x.shape
    assert T >= 2
    x_tm = jnp.transpose(x, (1, 0, 2)).reshape(T * B, I)   # time-major flatten

    # Everything fits in VMEM (<0.2 MiB): whole-array specs, no grid,
    # no pipelining machinery (latency bound, per perf review).
    vmem = pl.BlockSpec(memory_space=pltpu.MemorySpace.VMEM)
    kernel = functools.partial(lstm_mlp_kernel, seq_len=T, batch=B, hidden=HIDDEN1)
    out_pad = pl.pallas_call(
        kernel,
        out_shape=jax.ShapeDtypeStruct((NUM_LAYERS * B, LANE), jnp.float32),
        in_specs=[vmem] * (1 + len(packed)),
        out_specs=vmem,
        scratch_shapes=[pltpu.VMEM((T, B, 8 * HIDDEN1), jnp.float32)],
        cost_estimate=pl.CostEstimate(
            flops=750_000, transcendentals=6_000, bytes_accessed=110_000),
    )(x_tm, *packed)
    return out_pad[:, :NUM_CLASSES]


# ------------------------- reference (pure JAX) -------------------------------
def lstm_1_reference(x, params):
    B = x.shape[0]
    H = HIDDEN1
    hs = [jnp.zeros((B, H), jnp.float32) for _ in range(NUM_LAYERS)]
    cs = [jnp.zeros((B, H), jnp.float32) for _ in range(NUM_LAYERS)]
    for t in range(x.shape[1]):
        inp = x[:, t, :]
        for l in range(NUM_LAYERS):
            wi = params[f"w_ih_l{l}"]
            wh = params[f"w_hh_l{l}"]
            b = params[f"b_ih_l{l}"] + params[f"b_hh_l{l}"]
            gates = inp @ wi.T + hs[l] @ wh.T + b
            i_g = jax.nn.sigmoid(gates[:, 0 * H:1 * H])
            f_g = jax.nn.sigmoid(gates[:, 1 * H:2 * H])
            g_g = jnp.tanh(gates[:, 2 * H:3 * H])
            o_g = jax.nn.sigmoid(gates[:, 3 * H:4 * H])
            cs[l] = f_g * cs[l] + i_g * g_g
            hs[l] = o_g * jnp.tanh(cs[l])
            inp = hs[l]
    hn = jnp.concatenate(hs, axis=0)
    out = jnp.maximum(hn, 0.0)
    out = jnp.maximum(out @ params["fc1_w"].T + params["fc1_b"], 0.0)
    out = jnp.maximum(out @ params["fc2_w"].T + params["fc2_b"], 0.0)
    out = out @ params["fc3_w"].T + params["fc3_b"]
    return out


# --------------------------- parameter init -----------------------------------
def init_params(key):
    ks = iter(jax.random.split(key, 32))
    params = {}
    bound = 1.0 / jnp.sqrt(HIDDEN1)
    for l in range(NUM_LAYERS):
        in_dim = INPUT_SIZE if l == 0 else HIDDEN1
        params[f"w_ih_l{l}"] = jax.random.uniform(
            next(ks), (4 * HIDDEN1, in_dim), jnp.float32, -bound, bound)
        params[f"w_hh_l{l}"] = jax.random.uniform(
            next(ks), (4 * HIDDEN1, HIDDEN1), jnp.float32, -bound, bound)
        params[f"b_ih_l{l}"] = jax.random.uniform(
            next(ks), (4 * HIDDEN1,), jnp.float32, -bound, bound)
        params[f"b_hh_l{l}"] = jax.random.uniform(
            next(ks), (4 * HIDDEN1,), jnp.float32, -bound, bound)

    def xavier(k, shape):
        limit = jnp.sqrt(6.0 / (shape[0] + shape[1]))
        return jax.random.uniform(k, shape, jnp.float32, -limit, limit)

    params["fc1_w"] = xavier(next(ks), (HIDDEN2, HIDDEN1))
    params["fc1_b"] = jax.random.uniform(
        next(ks), (HIDDEN2,), jnp.float32, -1 / jnp.sqrt(HIDDEN1), 1 / jnp.sqrt(HIDDEN1))
    params["fc2_w"] = xavier(next(ks), (HIDDEN3, HIDDEN2))
    params["fc2_b"] = jax.random.uniform(
        next(ks), (HIDDEN3,), jnp.float32, -1 / jnp.sqrt(HIDDEN2), 1 / jnp.sqrt(HIDDEN2))
    params["fc3_w"] = xavier(next(ks), (NUM_CLASSES, HIDDEN3))
    params["fc3_b"] = jax.random.uniform(
        next(ks), (NUM_CLASSES,), jnp.float32, -1 / jnp.sqrt(HIDDEN3), 1 / jnp.sqrt(HIDDEN3))
    return params


# --------------------------------- main ---------------------------------------
if __name__ == "__main__":
    key = jax.random.PRNGKey(0)
    k_x, k_p = jax.random.split(key)

    x = jax.random.normal(k_x, (BATCH, SEQ_LEN, INPUT_SIZE), jnp.float32)
    params = init_params(k_p)

    # One-time weight packing (hoisted out of the per-call path).
    packed = prepare_params(params)

    out = jax.block_until_ready(lstm_1_forward(x, packed))

    ref = lstm_1_reference(x, params)
    assert out.shape == (NUM_LAYERS * BATCH, NUM_CLASSES), out.shape
    # Wavefront fuses matmul groupings and evaluates sigmoid via tanh, so the
    # result is no longer bit-identical to the reference; 1e-4 is still far
    # tighter than any structural/gate-ordering error.
    assert jnp.allclose(out, ref, rtol=1e-4, atol=1e-4), (
        f"max abs err = {jnp.max(jnp.abs(out - ref))}")

    print("KERNEL_OK")
</pallas_src>

<mosaic_0001>
module attributes {stable_mosaic.version = 11 : i64} {
  func.func @lstm_mlp_kernel(%arg0: memref<16x16xf32, #tpu.memory_space<vmem>>, %arg1: memref<16x256xf32, #tpu.memory_space<vmem>>, %arg2: memref<1x256xf32, #tpu.memory_space<vmem>>, %arg3: memref<64x256xf32, #tpu.memory_space<vmem>>, %arg4: memref<32x32xf32, #tpu.memory_space<vmem>>, %arg5: memref<1x32xf32, #tpu.memory_space<vmem>>, %arg6: memref<32x16xf32, #tpu.memory_space<vmem>>, %arg7: memref<1x16xf32, #tpu.memory_space<vmem>>, %arg8: memref<16x128xf32, #tpu.memory_space<vmem>>, %arg9: memref<1x128xf32, #tpu.memory_space<vmem>>, %arg10: memref<4x128xf32, #tpu.memory_space<vmem>>, %arg11: memref<8x2x256xf32, #tpu.memory_space<vmem>>) attributes {dimension_semantics = [], scalar_prefetch = 0 : i64, scratch_operands = 1 : i64, tpu.core_type = #tpu.core_type<tc>} {
    %c0 = arith.constant 0 : index
    %c0_0 = arith.constant 0 : index
    %0 = vector.load %arg0[%c0, %c0_0] : memref<16x16xf32, #tpu.memory_space<vmem>>, vector<16x16xf32>
    %c0_1 = arith.constant 0 : index
    %c0_2 = arith.constant 0 : index
    %1 = vector.load %arg1[%c0_1, %c0_2] : memref<16x256xf32, #tpu.memory_space<vmem>>, vector<16x256xf32>
    %cst = arith.constant dense<0.000000e+00> : vector<16x256xf32>
    %2 = tpu.matmul %0, %1, %cst {dimension_numbers = #tpu.dot_dimension_numbers<[1], [0], [0], [1], [0, 0, 1, 1], [], []>} : vector<16x16xf32>, vector<16x256xf32>, vector<16x256xf32> -> vector<16x256xf32>
    %c0_3 = arith.constant 0 : index
    %c0_4 = arith.constant 0 : index
    %3 = vector.load %arg2[%c0_3, %c0_4] : memref<1x256xf32, #tpu.memory_space<vmem>>, vector<1x256xf32>
    %4 = vector.broadcast %3 : vector<1x256xf32> to vector<16x256xf32>
    %5 = arith.addf %2, %4 : vector<16x256xf32>
    %6 = tpu.iota {dimensions = array<i32: 1>} : vector<1x256xi32>
    %c63_i32 = arith.constant 63 : i32
    %7 = vector.broadcast %c63_i32 : i32 to vector<1x256xi32>
    %8 = arith.andi %6, %7 : vector<1x256xi32>
    %c32_i32 = arith.constant 32 : i32
    %9 = vector.broadcast %c32_i32 : i32 to vector<1x256xi32>
    %10 = arith.cmpi slt, %8, %9 : vector<1x256xi32>
    %11 = vector.extract_strided_slice %5 {offsets = [0, 0], sizes = [2, 256], strides = [1, 1]} : vector<16x256xf32> to vector<2x256xf32>
    %cst_5 = arith.constant 0.000000e+00 : f32
    %12 = vector.shape_cast %10 : vector<1x256xi1> to vector<1x256xi1>
    %13 = vector.broadcast %12 : vector<1x256xi1> to vector<2x256xi1>
    %14 = vector.broadcast %cst_5 : f32 to vector<2x256xf32>
    %15 = arith.select %13, %11, %14 : vector<2x256xi1>, vector<2x256xf32>
    %c0_6 = arith.constant 0 : index
    %c0_7 = arith.constant 0 : index
    %c0_8 = arith.constant 0 : index
    %16 = vector.load %arg11[%c0_6, %c0_7, %c0_8] : memref<8x2x256xf32, #tpu.memory_space<vmem>>, vector<1x2x256xf32>
    %17 = vector.shape_cast %16 : vector<1x2x256xf32> to vector<2x256xf32>
    %18 = vector.shape_cast %15 : vector<2x256xf32> to vector<1x2x256xf32>
    tpu.vector_store %arg11[%c0_6, %c0_7, %c0_8], %18 {strides = array<i32>} : memref<8x2x256xf32, #tpu.memory_space<vmem>>, vector<1x2x256xf32>,
    %19 = vector.extract_strided_slice %5 {offsets = [2, 0], sizes = [2, 256], strides = [1, 1]} : vector<16x256xf32> to vector<2x256xf32>
    %c1 = arith.constant 1 : index
    %c0_9 = arith.constant 0 : index
    %c0_10 = arith.constant 0 : index
    %20 = vector.load %arg11[%c1, %c0_9, %c0_10] : memref<8x2x256xf32, #tpu.memory_space<vmem>>, vector<1x2x256xf32>
    %21 = vector.shape_cast %20 : vector<1x2x256xf32> to vector<2x256xf32>
    %22 = vector.shape_cast %19 : vector<2x256xf32> to vector<1x2x256xf32>
    tpu.vector_store %arg11[%c1, %c0_9, %c0_10], %22 {strides = array<i32>} : memref<8x2x256xf32, #tpu.memory_space<vmem>>, vector<1x2x256xf32>,
    %23 = vector.extract_strided_slice %5 {offsets = [4, 0], sizes = [2, 256], strides = [1, 1]} : vector<16x256xf32> to vector<2x256xf32>
    %c2 = arith.constant 2 : index
    %c0_11 = arith.constant 0 : index
    %c0_12 = arith.constant 0 : index
    %24 = vector.load %arg11[%c2, %c0_11, %c0_12] : memref<8x2x256xf32, #tpu.memory_space<vmem>>, vector<1x2x256xf32>
    %25 = vector.shape_cast %24 : vector<1x2x256xf32> to vector<2x256xf32>
    %26 = vector.shape_cast %23 : vector<2x256xf32> to vector<1x2x256xf32>
    tpu.vector_store %arg11[%c2, %c0_11, %c0_12], %26 {strides = array<i32>} : memref<8x2x256xf32, #tpu.memory_space<vmem>>, vector<1x2x256xf32>,
    %27 = vector.extract_strided_slice %5 {offsets = [6, 0], sizes = [2, 256], strides = [1, 1]} : vector<16x256xf32> to vector<2x256xf32>
    %c3 = arith.constant 3 : index
    %c0_13 = arith.constant 0 : index
    %c0_14 = arith.constant 0 : index
    %28 = vector.load %arg11[%c3, %c0_13, %c0_14] : memref<8x2x256xf32, #tpu.memory_space<vmem>>, vector<1x2x256xf32>
    %29 = vector.shape_cast %28 : vector<1x2x256xf32> to vector<2x256xf32>
    %30 = vector.shape_cast %27 : vector<2x256xf32> to vector<1x2x256xf32>
    tpu.vector_store %arg11[%c3, %c0_13, %c0_14], %30 {strides = array<i32>} : memref<8x2x256xf32, #tpu.memory_space<vmem>>, vector<1x2x256xf32>,
    %31 = vector.extract_strided_slice %5 {offsets = [8, 0], sizes = [2, 256], strides = [1, 1]} : vector<16x256xf32> to vector<2x256xf32>
    %c4 = arith.constant 4 : index
    %c0_15 = arith.constant 0 : index
    %c0_16 = arith.constant 0 : index
    %32 = vector.load %arg11[%c4, %c0_15, %c0_16] : memref<8x2x256xf32, #tpu.memory_space<vmem>>, vector<1x2x256xf32>
    %33 = vector.shape_cast %32 : vector<1x2x256xf32> to vector<2x256xf32>
    %34 = vector.shape_cast %31 : vector<2x256xf32> to vector<1x2x256xf32>
    tpu.vector_store %arg11[%c4, %c0_15, %c0_16], %34 {strides = array<i32>} : memref<8x2x256xf32, #tpu.memory_space<vmem>>, vector<1x2x256xf32>,
    %35 = vector.extract_strided_slice %5 {offsets = [10, 0], sizes = [2, 256], strides = [1, 1]} : vector<16x256xf32> to vector<2x256xf32>
    %c5 = arith.constant 5 : index
    %c0_17 = arith.constant 0 : index
    %c0_18 = arith.constant 0 : index
    %36 = vector.load %arg11[%c5, %c0_17, %c0_18] : memref<8x2x256xf32, #tpu.memory_space<vmem>>, vector<1x2x256xf32>
    %37 = vector.shape_cast %36 : vector<1x2x256xf32> to vector<2x256xf32>
    %38 = vector.shape_cast %35 : vector<2x256xf32> to vector<1x2x256xf32>
    tpu.vector_store %arg11[%c5, %c0_17, %c0_18], %38 {strides = array<i32>} : memref<8x2x256xf32, #tpu.memory_space<vmem>>, vector<1x2x256xf32>,
    %39 = vector.extract_strided_slice %5 {offsets = [12, 0], sizes = [2, 256], strides = [1, 1]} : vector<16x256xf32> to vector<2x256xf32>
    %c6 = arith.constant 6 : index
    %c0_19 = arith.constant 0 : index
    %c0_20 = arith.constant 0 : index
    %40 = vector.load %arg11[%c6, %c0_19, %c0_20] : memref<8x2x256xf32, #tpu.memory_space<vmem>>, vector<1x2x256xf32>
    %41 = vector.shape_cast %40 : vector<1x2x256xf32> to vector<2x256xf32>
    %42 = vector.shape_cast %39 : vector<2x256xf32> to vector<1x2x256xf32>
    tpu.vector_store %arg11[%c6, %c0_19, %c0_20], %42 {strides = array<i32>} : memref<8x2x256xf32, #tpu.memory_space<vmem>>, vector<1x2x256xf32>,
    %43 = vector.extract_strided_slice %5 {offsets = [14, 0], sizes = [2, 256], strides = [1, 1]} : vector<16x256xf32> to vector<2x256xf32>
    %c7 = arith.constant 7 : index
    %c0_21 = arith.constant 0 : index
    %c0_22 = arith.constant 0 : index
    %44 = vector.load %arg11[%c7, %c0_21, %c0_22] : memref<8x2x256xf32, #tpu.memory_space<vmem>>, vector<1x2x256xf32>
    %45 = vector.shape_cast %44 : vector<1x2x256xf32> to vector<2x256xf32>
    %46 = vector.shape_cast %43 : vector<2x256xf32> to vector<1x2x256xf32>
    tpu.vector_store %arg11[%c7, %c0_21, %c0_22], %46 {strides = array<i32>} : memref<8x2x256xf32, #tpu.memory_space<vmem>>, vector<1x2x256xf32>,
    %c0_23 = arith.constant 0 : index
    %c0_24 = arith.constant 0 : index
    %47 = vector.load %arg3[%c0_23, %c0_24] : memref<64x256xf32, #tpu.memory_space<vmem>>, vector<64x256xf32>
    %cst_25 = arith.constant 0.000000e+00 : f32
    %48 = vector.broadcast %cst_25 : f32 to vector<2x64xf32>
    %c0_26 = arith.constant 0 : index
    %c0_27 = arith.constant 0 : index
    %c0_28 = arith.constant 0 : index
    %49 = vector.load %arg11[%c0_26, %c0_27, %c0_28] : memref<8x2x256xf32, #tpu.memory_space<vmem>>, vector<1x2x256xf32>
    %50 = vector.shape_cast %49 : vector<1x2x256xf32> to vector<2x256xf32>
    %51 = math.tanh %50 : vector<2x256xf32>
    %52 = vector.extract_strided_slice %51 {offsets = [0, 0], sizes = [2, 64], strides = [1, 1]} : vector<2x256xf32> to vector<2x64xf32>
    %cst_29 = arith.constant 5.000000e-01 : f32
    %53 = vector.broadcast %cst_29 : f32 to vector<2x64xf32>
    %54 = arith.mulf %53, %52 : vector<2x64xf32>
    %cst_30 = arith.constant 5.000000e-01 : f32
    %55 = vector.broadcast %cst_30 : f32 to vector<2x64xf32>
    %56 = arith.addf %55, %54 : vector<2x64xf32>
    %57 = vector.extract_strided_slice %51 {offsets = [0, 64], sizes = [2, 64], strides = [1, 1]} : vector<2x256xf32> to vector<2x64xf32>
    %cst_31 = arith.constant 5.000000e-01 : f32
    %58 = vector.broadcast %cst_31 : f32 to vector<2x64xf32>
    %59 = arith.mulf %58, %57 : vector<2x64xf32>
    %cst_32 = arith.constant 5.000000e-01 : f32
    %60 = vector.broadcast %cst_32 : f32 to vector<2x64xf32>
    %61 = arith.addf %60, %59 : vector<2x64xf32>
    %62 = vector.extract_strided_slice %51 {offsets = [0, 128], sizes = [2, 64], strides = [1, 1]} : vector<2x256xf32> to vector<2x64xf32>
    %63 = vector.extract_strided_slice %51 {offsets = [0, 192], sizes = [2, 64], strides = [1, 1]} : vector<2x256xf32> to vector<2x64xf32>
    %cst_33 = arith.constant 5.000000e-01 : f32
    %64 = vector.broadcast %cst_33 : f32 to vector<2x64xf32>
    %65 = arith.mulf %64, %63 : vector<2x64xf32>
    %cst_34 = arith.constant 5.000000e-01 : f32
    %66 = vector.broadcast %cst_34 : f32 to vector<2x64xf32>
    %67 = arith.addf %66, %65 : vector<2x64xf32>
    %68 = arith.mulf %61, %48 : vector<2x64xf32>
    %69 = arith.mulf %56, %62 : vector<2x64xf32>
    %70 = arith.addf %68, %69 : vector<2x64xf32>
    %71 = math.tanh %70 : vector<2x64xf32>
    %72 = arith.mulf %67, %71 : vector<2x64xf32>
    %c1_35 = arith.constant 1 : index
    %c0_36 = arith.constant 0 : index
    %c0_37 = arith.constant 0 : index
    %73 = vector.load %arg11[%c1_35, %c0_36, %c0_37] : memref<8x2x256xf32, #tpu.memory_space<vmem>>, vector<1x2x256xf32>
    %74 = vector.shape_cast %73 : vector<1x2x256xf32> to vector<2x256xf32>
    %cst_38 = arith.constant dense<0.000000e+00> : vector<2x256xf32>
    %75 = tpu.matmul %72, %47, %cst_38 {dimension_numbers = #tpu.dot_dimension_numbers<[1], [0], [0], [1], [0, 0, 1, 1], [], []>} : vector<2x64xf32>, vector<64x256xf32>, vector<2x256xf32> -> vector<2x256xf32>
    %76 = arith.addf %74, %75 : vector<2x256xf32>
    %77 = math.tanh %76 : vector<2x256xf32>
    %78 = vector.extract_strided_slice %77 {offsets = [0, 0], sizes = [2, 64], strides = [1, 1]} : vector<2x256xf32> to vector<2x64xf32>
    %cst_39 = arith.constant 5.000000e-01 : f32
    %79 = vector.broadcast %cst_39 : f32 to vector<2x64xf32>
    %80 = arith.mulf %79, %78 : vector<2x64xf32>
    %cst_40 = arith.constant 5.000000e-01 : f32
    %81 = vector.broadcast %cst_40 : f32 to vector<2x64xf32>
    %82 = arith.addf %81, %80 : vector<2x64xf32>
    %83 = vector.extract_strided_slice %77 {offsets = [0, 64], sizes = [2, 64], strides = [1, 1]} : vector<2x256xf32> to vector<2x64xf32>
    %cst_41 = arith.constant 5.000000e-01 : f32
    %84 = vector.broadcast %cst_41 : f32 to vector<2x64xf32>
    %85 = arith.mulf %84, %83 : vector<2x64xf32>
    %cst_42 = arith.constant 5.000000e-01 : f32
    %86 = vector.broadcast %cst_42 : f32 to vector<2x64xf32>
    %87 = arith.addf %86, %85 : vector<2x64xf32>
    %88 = vector.extract_strided_slice %77 {offsets = [0, 128], sizes = [2, 64], strides = [1, 1]} : vector<2x256xf32> to vector<2x64xf32>
    %89 = vector.extract_strided_slice %77 {offsets = [0, 192], sizes = [2, 64], strides = [1, 1]} : vector<2x256xf32> to vector<2x64xf32>
    %cst_43 = arith.constant 5.000000e-01 : f32
    %90 = vector.broadcast %cst_43 : f32 to vector<2x64xf32>
    %91 = arith.mulf %90, %89 : vector<2x64xf32>
    %cst_44 = arith.constant 5.000000e-01 : f32
    %92 = vector.broadcast %cst_44 : f32 to vector<2x64xf32>
    %93 = arith.addf %92, %91 : vector<2x64xf32>
    %94 = arith.mulf %87, %70 : vector<2x64xf32>
    %95 = arith.mulf %82, %88 : vector<2x64xf32>
    %96 = arith.addf %94, %95 : vector<2x64xf32>
    %97 = math.tanh %96 : vector<2x64xf32>
    %98 = arith.mulf %93, %97 : vector<2x64xf32>
    %c2_45 = arith.constant 2 : index
    %c0_46 = arith.constant 0 : index
    %c0_47 = arith.constant 0 : index
    %99 = vector.load %arg11[%c2_45, %c0_46, %c0_47] : memref<8x2x256xf32, #tpu.memory_space<vmem>>, vector<1x2x256xf32>
    %100 = vector.shape_cast %99 : vector<1x2x256xf32> to vector<2x256xf32>
    %cst_48 = arith.constant dense<0.000000e+00> : vector<2x256xf32>
    %101 = tpu.matmul %98, %47, %cst_48 {dimension_numbers = #tpu.dot_dimension_numbers<[1], [0], [0], [1], [0, 0, 1, 1], [], []>} : vector<2x64xf32>, vector<64x256xf32>, vector<2x256xf32> -> vector<2x256xf32>
    %102 = arith.addf %100, %101 : vector<2x256xf32>
    %103 = math.tanh %102 : vector<2x256xf32>
    %104 = vector.extract_strided_slice %103 {offsets = [0, 0], sizes = [2, 64], strides = [1, 1]} : vector<2x256xf32> to vector<2x64xf32>
    %cst_49 = arith.constant 5.000000e-01 : f32
    %105 = vector.broadcast %cst_49 : f32 to vector<2x64xf32>
    %106 = arith.mulf %105, %104 : vector<2x64xf32>
    %cst_50 = arith.constant 5.000000e-01 : f32
    %107 = vector.broadcast %cst_50 : f32 to vector<2x64xf32>
    %108 = arith.addf %107, %106 : vector<2x64xf32>
    %109 = vector.extract_strided_slice %103 {offsets = [0, 64], sizes = [2, 64], strides = [1, 1]} : vector<2x256xf32> to vector<2x64xf32>
    %cst_51 = arith.constant 5.000000e-01 : f32
    %110 = vector.broadcast %cst_51 : f32 to vector<2x64xf32>
    %111 = arith.mulf %110, %109 : vector<2x64xf32>
    %cst_52 = arith.constant 5.000000e-01 : f32
    %112 = vector.broadcast %cst_52 : f32 to vector<2x64xf32>
    %113 = arith.addf %112, %111 : vector<2x64xf32>
    %114 = vector.extract_strided_slice %103 {offsets = [0, 128], sizes = [2, 64], strides = [1, 1]} : vector<2x256xf32> to vector<2x64xf32>
    %115 = vector.extract_strided_slice %103 {offsets = [0, 192], sizes = [2, 64], strides = [1, 1]} : vector<2x256xf32> to vector<2x64xf32>
    %cst_53 = arith.constant 5.000000e-01 : f32
    %116 = vector.broadcast %cst_53 : f32 to vector<2x64xf32>
    %117 = arith.mulf %116, %115 : vector<2x64xf32>
    %cst_54 = arith.constant 5.000000e-01 : f32
    %118 = vector.broadcast %cst_54 : f32 to vector<2x64xf32>
    %119 = arith.addf %118, %117 : vector<2x64xf32>
    %120 = arith.mulf %113, %96 : vector<2x64xf32>
    %121 = arith.mulf %108, %114 : vector<2x64xf32>
    %122 = arith.addf %120, %121 : vector<2x64xf32>
    %123 = math.tanh %122 : vector<2x64xf32>
    %124 = arith.mulf %119, %123 : vector<2x64xf32>
    %c3_55 = arith.constant 3 : index
    %c0_56 = arith.constant 0 : index
    %c0_57 = arith.constant 0 : index
    %125 = vector.load %arg11[%c3_55, %c0_56, %c0_57] : memref<8x2x256xf32, #tpu.memory_space<vmem>>, vector<1x2x256xf32>
    %126 = vector.shape_cast %125 : vector<1x2x256xf32> to vector<2x256xf32>
    %cst_58 = arith.constant dense<0.000000e+00> : vector<2x256xf32>
    %127 = tpu.matmul %124, %47, %cst_58 {dimension_numbers = #tpu.dot_dimension_numbers<[1], [0], [0], [1], [0, 0, 1, 1], [], []>} : vector<2x64xf32>, vector<64x256xf32>, vector<2x256xf32> -> vector<2x256xf32>
    %128 = arith.addf %126, %127 : vector<2x256xf32>
    %129 = math.tanh %128 : vector<2x256xf32>
    %130 = vector.extract_strided_slice %129 {offsets = [0, 0], sizes = [2, 64], strides = [1, 1]} : vector<2x256xf32> to vector<2x64xf32>
    %cst_59 = arith.constant 5.000000e-01 : f32
    %131 = vector.broadcast %cst_59 : f32 to vector<2x64xf32>
    %132 = arith.mulf %131, %130 : vector<2x64xf32>
    %cst_60 = arith.constant 5.000000e-01 : f32
    %133 = vector.broadcast %cst_60 : f32 to vector<2x64xf32>
    %134 = arith.addf %133, %132 : vector<2x64xf32>
    %135 = vector.extract_strided_slice %129 {offsets = [0, 64], sizes = [2, 64], strides = [1, 1]} : vector<2x256xf32> to vector<2x64xf32>
    %cst_61 = arith.constant 5.000000e-01 : f32
    %136 = vector.broadcast %cst_61 : f32 to vector<2x64xf32>
    %137 = arith.mulf %136, %135 : vector<2x64xf32>
    %cst_62 = arith.constant 5.000000e-01 : f32
    %138 = vector.broadcast %cst_62 : f32 to vector<2x64xf32>
    %139 = arith.addf %138, %137 : vector<2x64xf32>
    %140 = vector.extract_strided_slice %129 {offsets = [0, 128], sizes = [2, 64], strides = [1, 1]} : vector<2x256xf32> to vector<2x64xf32>
    %141 = vector.extract_strided_slice %129 {offsets = [0, 192], sizes = [2, 64], strides = [1, 1]} : vector<2x256xf32> to vector<2x64xf32>
    %cst_63 = arith.constant 5.000000e-01 : f32
    %142 = vector.broadcast %cst_63 : f32 to vector<2x64xf32>
    %143 = arith.mulf %142, %141 : vector<2x64xf32>
    %cst_64 = arith.constant 5.000000e-01 : f32
    %144 = vector.broadcast %cst_64 : f32 to vector<2x64xf32>
    %145 = arith.addf %144, %143 : vector<2x64xf32>
    %146 = arith.mulf %139, %122 : vector<2x64xf32>
    %147 = arith.mulf %134, %140 : vector<2x64xf32>
    %148 = arith.addf %146, %147 : vector<2x64xf32>
    %149 = math.tanh %148 : vector<2x64xf32>
    %150 = arith.mulf %145, %149 : vector<2x64xf32>
    %c4_65 = arith.constant 4 : index
    %c0_66 = arith.constant 0 : index
    %c0_67 = arith.constant 0 : index
    %151 = vector.load %arg11[%c4_65, %c0_66, %c0_67] : memref<8x2x256xf32, #tpu.memory_space<vmem>>, vector<1x2x256xf32>
    %152 = vector.shape_cast %151 : vector<1x2x256xf32> to vector<2x256xf32>
    %cst_68 = arith.constant dense<0.000000e+00> : vector<2x256xf32>
    %153 = tpu.matmul %150, %47, %cst_68 {dimension_numbers = #tpu.dot_dimension_numbers<[1], [0], [0], [1], [0, 0, 1, 1], [], []>} : vector<2x64xf32>, vector<64x256xf32>, vector<2x256xf32> -> vector<2x256xf32>
    %154 = arith.addf %152, %153 : vector<2x256xf32>
    %155 = math.tanh %154 : vector<2x256xf32>
    %156 = vector.extract_strided_slice %155 {offsets = [0, 0], sizes = [2, 64], strides = [1, 1]} : vector<2x256xf32> to vector<2x64xf32>
    %cst_69 = arith.constant 5.000000e-01 : f32
    %157 = vector.broadcast %cst_69 : f32 to vector<2x64xf32>
    %158 = arith.mulf %157, %156 : vector<2x64xf32>
    %cst_70 = arith.constant 5.000000e-01 : f32
    %159 = vector.broadcast %cst_70 : f32 to vector<2x64xf32>
    %160 = arith.addf %159, %158 : vector<2x64xf32>
    %161 = vector.extract_strided_slice %155 {offsets = [0, 64], sizes = [2, 64], strides = [1, 1]} : vector<2x256xf32> to vector<2x64xf32>
    %cst_71 = arith.constant 5.000000e-01 : f32
    %162 = vector.broadcast %cst_71 : f32 to vector<2x64xf32>
    %163 = arith.mulf %162, %161 : vector<2x64xf32>
    %cst_72 = arith.constant 5.000000e-01 : f32
    %164 = vector.broadcast %cst_72 : f32 to vector<2x64xf32>
    %165 = arith.addf %164, %163 : vector<2x64xf32>
    %166 = vector.extract_strided_slice %155 {offsets = [0, 128], sizes = [2, 64], strides = [1, 1]} : vector<2x256xf32> to vector<2x64xf32>
    %167 = vector.extract_strided_slice %155 {offsets = [0, 192], sizes = [2, 64], strides = [1, 1]} : vector<2x256xf32> to vector<2x64xf32>
    %cst_73 = arith.constant 5.000000e-01 : f32
    %168 = vector.broadcast %cst_73 : f32 to vector<2x64xf32>
    %169 = arith.mulf %168, %167 : vector<2x64xf32>
    %cst_74 = arith.constant 5.000000e-01 : f32
    %170 = vector.broadcast %cst_74 : f32 to vector<2x64xf32>
    %171 = arith.addf %170, %169 : vector<2x64xf32>
    %172 = arith.mulf %165, %148 : vector<2x64xf32>
    %173 = arith.mulf %160, %166 : vector<2x64xf32>
    %174 = arith.addf %172, %173 : vector<2x64xf32>
    %175 = math.tanh %174 : vector<2x64xf32>
    %176 = arith.mulf %171, %175 : vector<2x64xf32>
    %c5_75 = arith.constant 5 : index
    %c0_76 = arith.constant 0 : index
    %c0_77 = arith.constant 0 : index
    %177 = vector.load %arg11[%c5_75, %c0_76, %c0_77] : memref<8x2x256xf32, #tpu.memory_space<vmem>>, vector<1x2x256xf32>
    %178 = vector.shape_cast %177 : vector<1x2x256xf32> to vector<2x256xf32>
    %cst_78 = arith.constant dense<0.000000e+00> : vector<2x256xf32>
    %179 = tpu.matmul %176, %47, %cst_78 {dimension_numbers = #tpu.dot_dimension_numbers<[1], [0], [0], [1], [0, 0, 1, 1], [], []>} : vector<2x64xf32>, vector<64x256xf32>, vector<2x256xf32> -> vector<2x256xf32>
    %180 = arith.addf %178, %179 : vector<2x256xf32>
    %181 = math.tanh %180 : vector<2x256xf32>
    %182 = vector.extract_strided_slice %181 {offsets = [0, 0], sizes = [2, 64], strides = [1, 1]} : vector<2x256xf32> to vector<2x64xf32>
    %cst_79 = arith.constant 5.000000e-01 : f32
    %183 = vector.broadcast %cst_79 : f32 to vector<2x64xf32>
    %184 = arith.mulf %183, %182 : vector<2x64xf32>
    %cst_80 = arith.constant 5.000000e-01 : f32
    %185 = vector.broadcast %cst_80 : f32 to vector<2x64xf32>
    %186 = arith.addf %185, %184 : vector<2x64xf32>
    %187 = vector.extract_strided_slice %181 {offsets = [0, 64], sizes = [2, 64], strides = [1, 1]} : vector<2x256xf32> to vector<2x64xf32>
    %cst_81 = arith.constant 5.000000e-01 : f32
    %188 = vector.broadcast %cst_81 : f32 to vector<2x64xf32>
    %189 = arith.mulf %188, %187 : vector<2x64xf32>
    %cst_82 = arith.constant 5.000000e-01 : f32
    %190 = vector.broadcast %cst_82 : f32 to vector<2x64xf32>
    %191 = arith.addf %190, %189 : vector<2x64xf32>
    %192 = vector.extract_strided_slice %181 {offsets = [0, 128], sizes = [2, 64], strides = [1, 1]} : vector<2x256xf32> to vector<2x64xf32>
    %193 = vector.extract_strided_slice %181 {offsets = [0, 192], sizes = [2, 64], strides = [1, 1]} : vector<2x256xf32> to vector<2x64xf32>
    %cst_83 = arith.constant 5.000000e-01 : f32
    %194 = vector.broadcast %cst_83 : f32 to vector<2x64xf32>
    %195 = arith.mulf %194, %193 : vector<2x64xf32>
    %cst_84 = arith.constant 5.000000e-01 : f32
    %196 = vector.broadcast %cst_84 : f32 to vector<2x64xf32>
    %197 = arith.addf %196, %195 : vector<2x64xf32>
    %198 = arith.mulf %191, %174 : vector<2x64xf32>
    %199 = arith.mulf %186, %192 : vector<2x64xf32>
    %200 = arith.addf %198, %199 : vector<2x64xf32>
    %201 = math.tanh %200 : vector<2x64xf32>
    %202 = arith.mulf %197, %201 : vector<2x64xf32>
    %c6_85 = arith.constant 6 : index
    %c0_86 = arith.constant 0 : index
    %c0_87 = arith.constant 0 : index
    %203 = vector.load %arg11[%c6_85, %c0_86, %c0_87] : memref<8x2x256xf32, #tpu.memory_space<vmem>>, vector<1x2x256xf32>
    %204 = vector.shape_cast %203 : vector<1x2x256xf32> to vector<2x256xf32>
    %cst_88 = arith.constant dense<0.000000e+00> : vector<2x256xf32>
    %205 = tpu.matmul %202, %47, %cst_88 {dimension_numbers = #tpu.dot_dimension_numbers<[1], [0], [0], [1], [0, 0, 1, 1], [], []>} : vector<2x64xf32>, vector<64x256xf32>, vector<2x256xf32> -> vector<2x256xf32>
    %206 = arith.addf %204, %205 : vector<2x256xf32>
    %207 = math.tanh %206 : vector<2x256xf32>
    %208 = vector.extract_strided_slice %207 {offsets = [0, 0], sizes = [2, 64], strides = [1, 1]} : vector<2x256xf32> to vector<2x64xf32>
    %cst_89 = arith.constant 5.000000e-01 : f32
    %209 = vector.broadcast %cst_89 : f32 to vector<2x64xf32>
    %210 = arith.mulf %209, %208 : vector<2x64xf32>
    %cst_90 = arith.constant 5.000000e-01 : f32
    %211 = vector.broadcast %cst_90 : f32 to vector<2x64xf32>
    %212 = arith.addf %211, %210 : vector<2x64xf32>
    %213 = vector.extract_strided_slice %207 {offsets = [0, 64], sizes = [2, 64], strides = [1, 1]} : vector<2x256xf32> to vector<2x64xf32>
    %cst_91 = arith.constant 5.000000e-01 : f32
    %214 = vector.broadcast %cst_91 : f32 to vector<2x64xf32>
    %215 = arith.mulf %214, %213 : vector<2x64xf32>
    %cst_92 = arith.constant 5.000000e-01 : f32
    %216 = vector.broadcast %cst_92 : f32 to vector<2x64xf32>
    %217 = arith.addf %216, %215 : vector<2x64xf32>
    %218 = vector.extract_strided_slice %207 {offsets = [0, 128], sizes = [2, 64], strides = [1, 1]} : vector<2x256xf32> to vector<2x64xf32>
    %219 = vector.extract_strided_slice %207 {offsets = [0, 192], sizes = [2, 64], strides = [1, 1]} : vector<2x256xf32> to vector<2x64xf32>
    %cst_93 = arith.constant 5.000000e-01 : f32
    %220 = vector.broadcast %cst_93 : f32 to vector<2x64xf32>
    %221 = arith.mulf %220, %219 : vector<2x64xf32>
    %cst_94 = arith.constant 5.000000e-01 : f32
    %222 = vector.broadcast %cst_94 : f32 to vector<2x64xf32>
    %223 = arith.addf %222, %221 : vector<2x64xf32>
    %224 = arith.mulf %217, %200 : vector<2x64xf32>
    %225 = arith.mulf %212, %218 : vector<2x64xf32>
    %226 = arith.addf %224, %225 : vector<2x64xf32>
    %227 = math.tanh %226 : vector<2x64xf32>
    %228 = arith.mulf %223, %227 : vector<2x64xf32>
    %c7_95 = arith.constant 7 : index
    %c0_96 = arith.constant 0 : index
    %c0_97 = arith.constant 0 : index
    %229 = vector.load %arg11[%c7_95, %c0_96, %c0_97] : memref<8x2x256xf32, #tpu.memory_space<vmem>>, vector<1x2x256xf32>
    %230 = vector.shape_cast %229 : vector<1x2x256xf32> to vector<2x256xf32>
    %cst_98 = arith.constant dense<0.000000e+00> : vector<2x256xf32>
    %231 = tpu.matmul %228, %47, %cst_98 {dimension_numbers = #tpu.dot_dimension_numbers<[1], [0], [0], [1], [0, 0, 1, 1], [], []>} : vector<2x64xf32>, vector<64x256xf32>, vector<2x256xf32> -> vector<2x256xf32>
    %232 = arith.addf %230, %231 : vector<2x256xf32>
    %233 = math.tanh %232 : vector<2x256xf32>
    %234 = vector.extract_strided_slice %233 {offsets = [0, 0], sizes = [2, 64], strides = [1, 1]} : vector<2x256xf32> to vector<2x64xf32>
    %cst_99 = arith.constant 5.000000e-01 : f32
    %235 = vector.broadcast %cst_99 : f32 to vector<2x64xf32>
    %236 = arith.mulf %235, %234 : vector<2x64xf32>
    %cst_100 = arith.constant 5.000000e-01 : f32
    %237 = vector.broadcast %cst_100 : f32 to vector<2x64xf32>
    %238 = arith.addf %237, %236 : vector<2x64xf32>
    %239 = vector.extract_strided_slice %233 {offsets = [0, 64], sizes = [2, 64], strides = [1, 1]} : vector<2x256xf32> to vector<2x64xf32>
    %cst_101 = arith.constant 5.000000e-01 : f32
    %240 = vector.broadcast %cst_101 : f32 to vector<2x64xf32>
    %241 = arith.mulf %240, %239 : vector<2x64xf32>
    %cst_102 = arith.constant 5.000000e-01 : f32
    %242 = vector.broadcast %cst_102 : f32 to vector<2x64xf32>
    %243 = arith.addf %242, %241 : vector<2x64xf32>
    %244 = vector.extract_strided_slice %233 {offsets = [0, 128], sizes = [2, 64], strides = [1, 1]} : vector<2x256xf32> to vector<2x64xf32>
    %245 = vector.extract_strided_slice %233 {offsets = [0, 192], sizes = [2, 64], strides = [1, 1]} : vector<2x256xf32> to vector<2x64xf32>
    %cst_103 = arith.constant 5.000000e-01 : f32
    %246 = vector.broadcast %cst_103 : f32 to vector<2x64xf32>
    %247 = arith.mulf %246, %245 : vector<2x64xf32>
    %cst_104 = arith.constant 5.000000e-01 : f32
    %248 = vector.broadcast %cst_104 : f32 to vector<2x64xf32>
    %249 = arith.addf %248, %247 : vector<2x64xf32>
    %250 = arith.mulf %243, %226 : vector<2x64xf32>
    %251 = arith.mulf %238, %244 : vector<2x64xf32>
    %252 = arith.addf %250, %251 : vector<2x64xf32>
    %253 = math.tanh %252 : vector<2x64xf32>
    %254 = arith.mulf %249, %253 : vector<2x64xf32>
    %255 = vector.extract_strided_slice %254 {offsets = [0, 0], sizes = [2, 32], strides = [1, 1]} : vector<2x64xf32> to vector<2x32xf32>
    %c7_105 = arith.constant 7 : index
    %c0_106 = arith.constant 0 : index
    %c0_107 = arith.constant 0 : index
    %256 = vector.load %arg11[%c7_105, %c0_106, %c0_107] : memref<8x2x256xf32, #tpu.memory_space<vmem>>, vector<1x2x256xf32>
    %257 = vector.shape_cast %256 : vector<1x2x256xf32> to vector<2x256xf32>
    %cst_108 = arith.constant dense<0.000000e+00> : vector<2x256xf32>
    %258 = tpu.matmul %254, %47, %cst_108 {dimension_numbers = #tpu.dot_dimension_numbers<[1], [0], [0], [1], [0, 0, 1, 1], [], []>} : vector<2x64xf32>, vector<64x256xf32>, vector<2x256xf32> -> vector<2x256xf32>
    %259 = arith.addf %257, %258 : vector<2x256xf32>
    %260 = math.tanh %259 : vector<2x256xf32>
    %261 = vector.extract_strided_slice %260 {offsets = [0, 0], sizes = [2, 64], strides = [1, 1]} : vector<2x256xf32> to vector<2x64xf32>
    %cst_109 = arith.constant 5.000000e-01 : f32
    %262 = vector.broadcast %cst_109 : f32 to vector<2x64xf32>
    %263 = arith.mulf %262, %261 : vector<2x64xf32>
    %cst_110 = arith.constant 5.000000e-01 : f32
    %264 = vector.broadcast %cst_110 : f32 to vector<2x64xf32>
    %265 = arith.addf %264, %263 : vector<2x64xf32>
    %266 = vector.extract_strided_slice %260 {offsets = [0, 64], sizes = [2, 64], strides = [1, 1]} : vector<2x256xf32> to vector<2x64xf32>
    %cst_111 = arith.constant 5.000000e-01 : f32
    %267 = vector.broadcast %cst_111 : f32 to vector<2x64xf32>
    %268 = arith.mulf %267, %266 : vector<2x64xf32>
    %cst_112 = arith.constant 5.000000e-01 : f32
    %269 = vector.broadcast %cst_112 : f32 to vector<2x64xf32>
    %270 = arith.addf %269, %268 : vector<2x64xf32>
    %271 = vector.extract_strided_slice %260 {offsets = [0, 128], sizes = [2, 64], strides = [1, 1]} : vector<2x256xf32> to vector<2x64xf32>
    %272 = vector.extract_strided_slice %260 {offsets = [0, 192], sizes = [2, 64], strides = [1, 1]} : vector<2x256xf32> to vector<2x64xf32>
    %cst_113 = arith.constant 5.000000e-01 : f32
    %273 = vector.broadcast %cst_113 : f32 to vector<2x64xf32>
    %274 = arith.mulf %273, %272 : vector<2x64xf32>
    %cst_114 = arith.constant 5.000000e-01 : f32
    %275 = vector.broadcast %cst_114 : f32 to vector<2x64xf32>
    %276 = arith.addf %275, %274 : vector<2x64xf32>
    %277 = arith.mulf %270, %252 : vector<2x64xf32>
    %278 = arith.mulf %265, %271 : vector<2x64xf32>
    %279 = arith.addf %277, %278 : vector<2x64xf32>
    %280 = math.tanh %279 : vector<2x64xf32>
    %281 = arith.mulf %276, %280 : vector<2x64xf32>
    %282 = vector.extract_strided_slice %281 {offsets = [0, 32], sizes = [2, 32], strides = [1, 1]} : vector<2x64xf32> to vector<2x32xf32>
    %283 = tpu.concatenate %255, %282 in 0 : vector<2x32xf32>, vector<2x32xf32> -> vector<4x32xf32>
    %cst_115 = arith.constant 0.000000e+00 : f32
    %284 = vector.broadcast %cst_115 : f32 to vector<4x32xf32>
    %285 = arith.maximumf %283, %284 : vector<4x32xf32>
    %c0_116 = arith.constant 0 : index
    %c0_117 = arith.constant 0 : index
    %286 = vector.load %arg4[%c0_116, %c0_117] : memref<32x32xf32, #tpu.memory_space<vmem>>, vector<32x32xf32>
    %cst_118 = arith.constant dense<0.000000e+00> : vector<4x32xf32>
    %287 = tpu.matmul %285, %286, %cst_118 {dimension_numbers = #tpu.dot_dimension_numbers<[1], [0], [0], [1], [0, 0, 1, 1], [], []>} : vector<4x32xf32>, vector<32x32xf32>, vector<4x32xf32> -> vector<4x32xf32>
    %c0_119 = arith.constant 0 : index
    %c0_120 = arith.constant 0 : index
    %288 = vector.load %arg5[%c0_119, %c0_120] : memref<1x32xf32, #tpu.memory_space<vmem>>, vector<1x32xf32>
    %289 = vector.broadcast %288 : vector<1x32xf32> to vector<4x32xf32>
    %290 = arith.addf %287, %289 : vector<4x32xf32>
    %cst_121 = arith.constant 0.000000e+00 : f32
    %291 = vector.broadcast %cst_121 : f32 to vector<4x32xf32>
    %292 = arith.maximumf %290, %291 : vector<4x32xf32>
    %c0_122 = arith.constant 0 : index
    %c0_123 = arith.constant 0 : index
    %293 = vector.load %arg6[%c0_122, %c0_123] : memref<32x16xf32, #tpu.memory_space<vmem>>, vector<32x16xf32>
    %cst_124 = arith.constant dense<0.000000e+00> : vector<4x16xf32>
    %294 = tpu.matmul %292, %293, %cst_124 {dimension_numbers = #tpu.dot_dimension_numbers<[1], [0], [0], [1], [0, 0, 1, 1], [], []>} : vector<4x32xf32>, vector<32x16xf32>, vector<4x16xf32> -> vector<4x16xf32>
    %c0_125 = arith.constant 0 : index
    %c0_126 = arith.constant 0 : index
    %295 = vector.load %arg7[%c0_125, %c0_126] : memref<1x16xf32, #tpu.memory_space<vmem>>, vector<1x16xf32>
    %296 = vector.broadcast %295 : vector<1x16xf32> to vector<4x16xf32>
    %297 = arith.addf %294, %296 : vector<4x16xf32>
    %cst_127 = arith.constant 0.000000e+00 : f32
    %298 = vector.broadcast %cst_127 : f32 to vector<4x16xf32>
    %299 = arith.maximumf %297, %298 : vector<4x16xf32>
    %c0_128 = arith.constant 0 : index
    %c0_129 = arith.constant 0 : index
    %300 = vector.load %arg8[%c0_128, %c0_129] : memref<16x128xf32, #tpu.memory_space<vmem>>, vector<16x128xf32>
    %cst_130 = arith.constant dense<0.000000e+00> : vector<4x128xf32>
    %301 = tpu.matmul %299, %300, %cst_130 {dimension_numbers = #tpu.dot_dimension_numbers<[1], [0], [0], [1], [0, 0, 1, 1], [], []>} : vector<4x16xf32>, vector<16x128xf32>, vector<4x128xf32> -> vector<4x128xf32>
    %c0_131 = arith.constant 0 : index
    %c0_132 = arith.constant 0 : index
    %302 = vector.load %arg9[%c0_131, %c0_132] : memref<1x128xf32, #tpu.memory_space<vmem>>, vector<1x128xf32>
    %303 = vector.broadcast %302 : vector<1x128xf32> to vector<4x128xf32>
    %304 = arith.addf %301, %303 : vector<4x128xf32>
    %c0_133 = arith.constant 0 : index
    %c0_134 = arith.constant 0 : index
    %305 = vector.load %arg10[%c0_133, %c0_134] : memref<4x128xf32, #tpu.memory_space<vmem>>, vector<4x128xf32>
    tpu.vector_store %arg10[%c0_133, %c0_134], %304 {strides = array<i32>} : memref<4x128xf32, #tpu.memory_space<vmem>>, vector<4x128xf32>,
    return
  }
}

</mosaic_0001>

<bundles_post_ra>
// kernel: lstm_1_forward.1
= control target key start
LH: loop header
LB: loop body
LE: loop exit
PB: predicated region body
PF: predicated region fallthrough
CT: control target
= control target key end

     0   :  { %15 = vsyncpa [#allocation4], 0  ;;  %s2069_s0 = inlined_call_operand.vmem [shape: f32[16,16], index: 0, kind: input, shape index: {}]   ;;  %s2070_s1 = inlined_call_operand.vmem [shape: f32[16,256], index: 1, kind: input, shape index: {}]   ;;  %s2071_s2 = inlined_call_operand.vmem [shape: f32[1,256], index: 2, kind: input, shape index: {}]   ;;  %s2072_s3 = inlined_call_operand.hbm [shape: f32[64,256], index: 3, kind: input, shape index: {}]   ;;  %s2073_s4 = inlined_call_operand.vmem [shape: f32[32,32], index: 4, kind: input, shape index: {}]   ;;  %s2074_s5 = inlined_call_operand.vmem [shape: f32[1,32], index: 5, kind: input, shape index: {}]   ;;  %s2075_s6 = inlined_call_operand.vmem [shape: f32[32,16], index: 6, kind: input, shape index: {}]   ;;  %s2076_s7 = inlined_call_operand.vmem [shape: f32[1,16], index: 7, kind: input, shape index: {}]   ;;  %s2077_s8 = inlined_call_operand.vmem [shape: f32[16,128], index: 8, kind: input, shape index: {}]   ;;  %s2078_s9 = inlined_call_operand.vmem [shape: f32[1,128], index: 9, kind: input, shape index: {}]   ;;  %s2079_s10 = inlined_call_operand.hbm [shape: f32[4,128], index: 10, kind: output, shape index: {}]  }
   0x1   :  { %16 = vsyncpa [#allocation5], 0  ;;  %s1763_s13 = smov [#allocation3]   ;;  %s1715_s17 = scalar_lea.hbm %s2072_s3, 2048 }
   0x2   :  { %s28_s14 = sshll.u32 %s1763_s13, 4  ;;  %p1716_p0 = scmp.ne.s32.totalorder %s2072_s3, %s1715_s17  ;;  %s29_s14 = int_to_ptr.vmem [resolvable:$true] %s28_s14 }
   0x3   :  { %p1719_p1 = scmp.lt.u32.totalorder %s1715_s17, %s2072_s3 }
   0x5   :  { %p1721_p2 = pnand %p1719_p1, %p1716_p0 }
   0x7   :  { %1724 = shalt.err (!%p1721_p2)
}
   0x8   :  { %s1725_s22 = scalar_lea.vmem %s29_s14, 2048  ;;  %p1730_p4 = scmp.lt.s32.totalorder %s29_s14, %s29_s14 }
   0x9   :  { %p1726_p3 = scmp.ne.s32.totalorder %s29_s14, %s1725_s22  ;;  %p1731_p5 = scmp.lt.s32.totalorder %s1725_s22, %s1725_s22 }
   0xb   :  { %p1732_p6 = por %p1731_p5, %p1730_p4 }
   0xd   :  { %p1733_p7 = pnand %p1732_p6, %p1726_p3 }
   0xf   :  { %1736 = shalt.err (!%p1733_p7)
}
  0x10   :  { %s1764_s23 = smov 256   ;;  %s1765_s24 = smov 16  }
  0x11   :  { %34 = dma.hbm_to_vmem [thread:$0]  %s2072_s3, 2048, %s29_s14, [#allocation4], %s1764_s23, %s1764_s23, %s1765_s24  }
  0x12   :  { %1759 = dma.done.wait [#allocation4], 2048  }
  0x13   :  { %1760 = vsyncadd [#allocation4], 4294965248  ;;  %v1766_v0 = vmov 0.0   ;;  %v53_v1 = vld [vmem:[%s2070_s1 + $0x8] sm:$0xff]  ;;  %v55_v2 = vld [vmem:[%s2070_s1 + $0x18] sm:$0xff]  ;;  %vm68_vm0 = vcmask 130048   ;;  %v58_v8 = vlaneseq }
  0x14   :  { %139 = vmatprep.mubr.f32.mxu0 %v1766_v0  ;;  %349 = vmatprep.mubr.f32.mxu1 %v1766_v0  ;;  %v52_v3 = vld [vmem:[%s2070_s1] sm:$0xff]  ;;  %v1522_v4 = vpack.c.bf16 %v55_v2, %v53_v1  ;;  %v54_v5 = vld [vmem:[%s2070_s1 + $0x10] sm:$0xff]  ;;  %v1767_v14 = vmov 1983009808   ;;  %s1768_s1 = smov 64   ;;  %v239_v42 = vld [vmem:[#allocation3 + $0x8] sm:$0xff] }
  0x15   :  { %v1524_v6 = vpack.c.bf16 %v54_v5, %v52_v3  ;;  %v50_v7 = vld [vmem:[%s2069_s0] sm:$0xff]  ;;  %v59_v9 = vshrl.u32 %v58_v8, 7  ;;  %v153_v10 = vand.u32 127, %v58_v8  ;;  %v181_v15 = vunpack.c.l.s4 %v1767_v14  ;;  %v241_v43 = vld [vmem:[#allocation3 + $0x18] sm:$0xff]  ;;  %v240_v46 = vld [vmem:[#allocation3 + $0x10] sm:$0xff] }
  0x16   :  { %1523 = vmatprep.subr.bf16.mxu0 %v1522_v4  ;;  %v56_v13 = vld [vmem:[%s2071_s2] sm:$0x3]  ;;  %v1873_v45 = vpack.c.bf16 %v241_v43, %v239_v42  ;;  %v243_v47 = vld [vmem:[#allocation3 + $0x28] sm:$0xff]  ;;  %v245_v48 = vld [vmem:[#allocation3 + $0x38] sm:$0xff]  ;;  %vm281_vm3 = vcmask 523264   ;;  %vm1770_vm4 = vmmov 0  }
  0x17   :  { %1525 = vmatpush1.bf16.msra.mxu0 %v1524_v6  ;;  %v60_v11 = vsub.s32 0, %v59_v9  ;;  %v154_v12 = vadd.s32 128, %v153_v10  ;;  %v64_v16 = vsub.s32 1, %v59_v9  ;;  %v155_v17 = vand.u32 63, %v153_v10  ;;  %v238_v44 = vld [vmem:[#allocation3] sm:$0xff]  ;;  %v244_v52 = vld [vmem:[#allocation3 + $0x30] sm:$0xff] }
  0x18   :  { %v182_v20 = vunpack.c.0.s8 %v181_v15  ;;  %v1875_v49 = vpack.c.bf16 %v240_v46, %v238_v44  ;;  %v1877_v50 = vpack.c.bf16 %v245_v48, %v243_v47  ;;  %v242_v51 = vld [vmem:[#allocation3 + $0x20] sm:$0xff]  ;;  %v247_v53 = vld [vmem:[#allocation3 + $0x48] sm:$0xff]  ;;  %1527 = vmatprep.subr.bf16.mxu1 %v1873_v45  ;;  %v249_v54 = vld [vmem:[#allocation3 + $0x58] sm:$0xff]  ;;  %1543 = vmatprep.subr.bf16.mxu0 %v1873_v45  ;;  %vm1188_vm5 = vcmask 1041408  }
  0x19   :  { %v1862_v18 = vrot.slane %v56_v13, %v60_v11  ;;  %v156_v19 = vand.u32 63, %v154_v12  ;;  %v1864_v21 = vrot.slane %v56_v13, %v64_v16  ;;  %vm157_vm1 = vcmp.lt.s32.totalorder %v155_v17, 32  ;;  %v246_v57 = vld [vmem:[#allocation3 + $0x40] sm:$0xff]  ;;  %v248_v58 = vld [vmem:[#allocation3 + $0x50] sm:$0xff]  ;;  %v251_v59 = vld [vmem:[#allocation3 + $0x68] sm:$0xff] }
  0x1a   :  { %1460 = vmatmul.mubr.msk.f32.vlgmr.msra.gmra.mrb[0].mxu0 %vm68_vm0, %v50_v7  ;;  %v1867_v25 = vsub.s32 %v182_v20, %v59_v9  ;;  %1529 = vmatpush1.bf16.msra.mxu1 %v1875_v49  ;;  %v1883_v55 = vpack.c.bf16 %v244_v52, %v242_v51  ;;  %v1886_v56 = vpack.c.bf16 %v249_v54, %v247_v53  ;;  %v253_v60 = vld [vmem:[#allocation3 + $0x78] sm:$0xff]  ;;  %v250_v63 = vld [vmem:[#allocation3 + $0x60] sm:$0xff]  ;;  %v252_v1 = vld [vmem:[#allocation3 + $0x70] sm:$0xff]  ;;  %vm1202_vm6 = vcmask 261120  }
  0x1b   :  { %145 = vmatprep.mubr.f32.mxu0 %v1766_v0  ;;  %vm158_vm2 = vcmp.lt.s32.totalorder %v156_v19, 32  ;;  %1531 = vmatprep.subr.bf16.mxu1 %v1877_v50  ;;  %v1891_v61 = vpack.c.bf16 %v248_v58, %v246_v57  ;;  %v1894_v62 = vpack.c.bf16 %v253_v60, %v251_v59  ;;  %v1899_v2 = vpack.c.bf16 %v252_v1, %v250_v63 }
  0x1c   :  { %1545 = vmatpush1.bf16.msra.mxu0 %v1875_v49 }
  0x1d   :  { %1547 = vmatprep.subr.bf16.mxu0 %v1877_v50 }
  0x1e   :  { %1533 = vmatpush1.bf16.msra.mxu1 %v1883_v55 }
  0x1f   :  { %1535 = vmatprep.subr.bf16.mxu1 %v1886_v56 }
  0x20   :  { %1549 = vmatpush1.bf16.msra.mxu0 %v1883_v55 }
  0x21   :  { %1551 = vmatprep.subr.bf16.mxu0 %v1886_v56 }
  0x22   :  { %1537 = vmatpush1.bf16.msra.mxu1 %v1891_v61 }
  0x23   :  { %1539 = vmatprep.subr.bf16.mxu1 %v1894_v62 }
  0x24   :  { %1553 = vmatpush1.bf16.msra.mxu0 %v1891_v61 }
  0x25   :  { %1555 = vmatprep.subr.bf16.mxu0 %v1894_v62 }
  0x26   :  { %1541 = vmatpush1.bf16.msra.mxu1 %v1899_v2 }
  0x27   :  { %1559 = vmatprep.subr.bf16.mxu1 %v1873_v45 }
  0x28   :  { %1557 = vmatpush1.bf16.msra.mxu0 %v1899_v2 }
  0x29   :  { %1575 = vmatprep.subr.bf16.mxu0 %v1873_v45 }
  0xed   :  { %v141_v22 = vpop.f32.mrb[0].mxu0 }
  0xee   :  { %v142_v23 = vadd.f32 %v141_v22, %v1862_v18  ;;  %v143_v24 = vpop.f32.mrb[1].mxu0 }
  0xef   :  { %v144_v26 = vadd.f32 %v143_v24, %v1864_v21 }
  0xf0   :  { %v163_v27 = vsel %vm157_vm1, %v142_v23, 0.0 }
  0xf1   :  { %v164_v28 = vsel %vm158_vm2, %v144_v26, 0.0  ;;  %v179_v29 = vcombine.low %v142_v23, %v144_v26  ;;  %v191_v30 = vcombine.high %v142_v23, %v144_v26 }
  0xf2   :  { %v167_v31 = vcombine.low %v163_v27, %v164_v28  ;;  %v51_v27 = vld [vmem:[%s2069_s0 + $0x8] sm:$0xff]  ;;  %s1772_s0 = smov [#allocation6]  }
  0xf3   :  { %v186_v32 = vrot.slane %v179_v29, %v1867_v25  ;;  %v198_v33 = vrot.slane %v191_v30, %v1867_v25  ;;  %1463 = vst.sshfl [vmem:[#allocation2 + $0x8] sm:$0x33 pattern:$0x76325410] %v191_v30  ;;  %1461 = vmatmul.mubr.msk.f32.gmra.mrb[2].mxu0 %vm68_vm0, %v51_v27  ;;  %s1451_s19 = sshll.u32 %s1772_s0, 4  ;;  %s1452_s19 = int_to_ptr.vmem [resolvable:$true] %s1451_s19 }
  0xf4   :  { %1462 = vst.sshfl [vmem:[#allocation2] sm:$0x33 pattern:$0x76325410] %v167_v31  ;;  %461 = vmatprep.mubr.f32.mxu0 %v1766_v0  ;;  %p1742_p9 = scmp.lt.s32.totalorder %s1452_s19, %s1452_s19 }
  0xf5   :  { %v187_v34 = vcombine.high %v186_v32, %v186_v32  ;;  %v202_v35 = vcombine.high %v198_v33, %v198_v33 }
  0xf7   :  { %190 = vst [vmem:[#allocation2 + $0x4] sm:$0xf] %v187_v34  ;;  %205 = vst [vmem:[#allocation2 + $0xc] sm:$0xf] %v202_v35 }
  0xfa   :  { %v393_v53 = vld [vmem:[#allocation2 + $0x8] sm:$0xf] }
  0xfb   :  { %v254_v36 = vld [vmem:[#allocation2] sm:$0xf] }
  0xfc   :  { %1679 = vtanh.f32 %v254_v36 }
  0xfe   :  { %v280_v17 = vld [vmem:[#allocation2 + $0x4] sm:$0xf] }
 0x106   :  { %v1680_v37 = vpop.eup %1679 }
 0x107   :  { %v256_v38 = vmul.f32 0.5, %v1680_v37  ;;  %v266_v40 = vrot.slane %v1680_v37, 2 }
 0x109   :  { %v257_v39 = vadd.f32 0.5, %v256_v38 }
 0x10b   :  { %v268_v41 = vmul.f32 %v266_v40, %v257_v39  ;;  %v265_v3 = vmul.f32 0.0, %v257_v39 }
 0x10d   :  { %270 = vrot.lane.b32.xlu0 %v268_v41, %s1768_s1 }
 0x111   :  { %259 = vrot.lane.b32.xlu0 %v1680_v37, %s1768_s1 }
 0x17f   :  { %v271_v4 = vpop.permute.xlu0 %270 }
 0x180   :  { %v273_v5 = vadd.f32 %v271_v4, %v265_v3 }
 0x182   :  { %1681 = vtanh.f32 %v273_v5 }
 0x183   :  { %v260_v7 = vpop.permute.xlu0 %259 }
 0x184   :  { %v261_v8 = vrot.slane %v260_v7, 2 }
 0x186   :  { %v263_v9 = vmul.f32 0.5, %v261_v8 }
 0x188   :  { %v264_v10 = vadd.f32 0.5, %v263_v9 }
 0x18c   :  { %v1682_v6 = vpop.eup %1681 }
 0x18d   :  { %276 = vrot.lane.b32.xlu1 %v1682_v6, %s1768_s1 }
 0x1c6   :  { %v147_v32 = vpop.f32.mrb[2].mxu0 }
 0x1c7   :  { %v148_v33 = vadd.f32 %v147_v32, %v1862_v18  ;;  %v149_v34 = vpop.f32.mrb[3].mxu0 }
 0x1c8   :  { %v150_v35 = vadd.f32 %v149_v34, %v1864_v21 }
 0x1ca   :  { %v208_v36 = vcombine.low %v148_v33, %v150_v35  ;;  %v223_v37 = vcombine.high %v148_v33, %v150_v35 }
 0x1cc   :  { %v215_v38 = vrot.slane %v208_v36, %v1867_v25  ;;  %1464 = vst.sshfl [vmem:[#allocation2 + $0x10] sm:$0x33 pattern:$0x76325410] %v208_v36  ;;  %v230_v39 = vrot.slane %v223_v37, %v1867_v25 }
 0x1cd   :  { %1465 = vst.sshfl [vmem:[#allocation2 + $0x18] sm:$0x33 pattern:$0x76325410] %v223_v37 }
 0x1ce   :  { %v219_v40 = vcombine.high %v215_v38, %v215_v38  ;;  %v234_v41 = vcombine.high %v230_v39, %v230_v39 }
 0x1d0   :  { %222 = vst [vmem:[#allocation2 + $0x14] sm:$0xf] %v219_v40  ;;  %237 = vst [vmem:[#allocation2 + $0x1c] sm:$0xf] %v234_v41 }
 0x1d3   :  { %v617_v40 = vld [vmem:[#allocation2 + $0x10] sm:$0xf] }
 0x1ff   :  { %v277_v11 = vpop.permute.xlu1 %276 }
 0x200   :  { %v279_v12 = vmul.f32 %v277_v11, %v264_v10 }
 0x202   :  { %1466 = vmatmul.mubr.msk.f32.vlgmr.msra.gmra.mrb[0].mxu1 %vm281_vm3, %v279_v12 }
 0x203   :  { %1561 = vmatpush1.bf16.msra.mxu1 %v1875_v49  ;;  %573 = vmatprep.mubr.f32.mxu1 %v1766_v0 }
 0x204   :  { %1563 = vmatprep.subr.bf16.mxu1 %v1877_v50 }
 0x207   :  { %1565 = vmatpush1.bf16.msra.mxu1 %v1883_v55 }
 0x208   :  { %1567 = vmatprep.subr.bf16.mxu1 %v1886_v56 }
 0x20b   :  { %1569 = vmatpush1.bf16.msra.mxu1 %v1891_v61 }
 0x20c   :  { %1571 = vmatprep.subr.bf16.mxu1 %v1894_v62 }
 0x20f   :  { %1573 = vmatpush1.bf16.msra.mxu1 %v1899_v2 }
 0x210   :  { %1591 = vmatprep.subr.bf16.mxu1 %v1873_v45 }
 0x2d5   :  { %v351_v13 = vpop.f32.mrb[0].mxu1 }
 0x2d6   :  { %v353_v14 = vpop.f32.mrb[1].mxu1 }
 0x2d7   :  { %v358_v15 = vcombine.low %v351_v13, %v353_v14 }
 0x2d9   :  { %v365_v16 = vrot.slane %v358_v15, %v1867_v25 }
 0x2db   :  { %v367_v19 = vadd.f32 %v365_v16, %v280_v17  ;;  %v505_v16 = vld [vmem:[#allocation2 + $0xc] sm:$0xf] }
 0x2dd   :  { %1683 = vtanh.f32 %v367_v19 }
 0x2e7   :  { %v1684_v20 = vpop.eup %1683 }
 0x2e8   :  { %372 = vrot.lane.b32.xlu0 %v1684_v20, %s1768_s1  ;;  %v369_v22 = vmul.f32 0.5, %v1684_v20  ;;  %v379_v24 = vrot.slane %v1684_v20, 2 }
 0x2ea   :  { %v370_v23 = vadd.f32 0.5, %v369_v22 }
 0x2ec   :  { %v381_v26 = vmul.f32 %v379_v24, %v370_v23  ;;  %v378_v28 = vmul.f32 %v370_v23, %v273_v5 }
 0x2ee   :  { %383 = vrot.lane.b32.xlu1 %v381_v26, %s1768_s1 }
 0x35a   :  { %v373_v42 = vpop.permute.xlu0 %372 }
 0x35b   :  { %v374_v43 = vrot.slane %v373_v42, 2 }
 0x35d   :  { %v376_v44 = vmul.f32 0.5, %v374_v43 }
 0x35f   :  { %v377_v46 = vadd.f32 0.5, %v376_v44 }
 0x360   :  { %v384_v29 = vpop.permute.xlu1 %383 }
 0x361   :  { %v386_v30 = vadd.f32 %v384_v29, %v378_v28 }
 0x363   :  { %1685 = vtanh.f32 %v386_v30 }
 0x36d   :  { %v1686_v31 = vpop.eup %1685 }
 0x36e   :  { %389 = vrot.lane.b32.xlu1 %v1686_v31, %s1768_s1 }
 0x3e0   :  { %v390_v18 = vpop.permute.xlu1 %389 }
 0x3e1   :  { %v392_v47 = vmul.f32 %v390_v18, %v377_v46 }
 0x3e3   :  { %1467 = vmatmul.mubr.msk.f32.vlgmr.msra.gmra.mrb[4].mxu0 %vm281_vm3, %v392_v47 }
 0x3e4   :  { %1577 = vmatpush1.bf16.msra.mxu0 %v1875_v49  ;;  %685 = vmatprep.mubr.f32.mxu0 %v1766_v0 }
 0x3e5   :  { %1579 = vmatprep.subr.bf16.mxu0 %v1877_v50 }
 0x3e8   :  { %1581 = vmatpush1.bf16.msra.mxu0 %v1883_v55 }
 0x3e9   :  { %1583 = vmatprep.subr.bf16.mxu0 %v1886_v56 }
 0x3ec   :  { %1585 = vmatpush1.bf16.msra.mxu0 %v1891_v61 }
 0x3ed   :  { %1587 = vmatprep.subr.bf16.mxu0 %v1894_v62 }
 0x3f0   :  { %1589 = vmatpush1.bf16.msra.mxu0 %v1899_v2 }
 0x3f1   :  { %1607 = vmatprep.subr.bf16.mxu0 %v1873_v45 }
 0x4b6   :  { %v463_v21 = vpop.f32.mrb[4].mxu0 }
 0x4b7   :  { %v465_v48 = vpop.f32.mrb[5].mxu0 }
 0x4b8   :  { %v470_v51 = vcombine.low %v463_v21, %v465_v48 }
 0x4ba   :  { %v477_v52 = vrot.slane %v470_v51, %v1867_v25 }
 0x4bc   :  { %v479_v54 = vadd.f32 %v477_v52, %v393_v53 }
 0x4be   :  { %1687 = vtanh.f32 %v479_v54 }
 0x4c8   :  { %v1688_v57 = vpop.eup %1687 }
 0x4c9   :  { %484 = vrot.lane.b32.xlu1 %v1688_v57, %s1768_s1  ;;  %v481_v58 = vmul.f32 0.5, %v1688_v57  ;;  %v491_v60 = vrot.slane %v1688_v57, 2 }
 0x4cb   :  { %v482_v59 = vadd.f32 0.5, %v481_v58 }
 0x4cd   :  { %v493_v63 = vmul.f32 %v491_v60, %v482_v59  ;;  %v490_v1 = vmul.f32 %v482_v59, %v386_v30 }
 0x4cf   :  { %495 = vrot.lane.b32.xlu0 %v493_v63, %s1768_s1 }
 0x53b   :  { %v485_v6 = vpop.permute.xlu1 %484 }
 0x53c   :  { %v486_v7 = vrot.slane %v485_v6, 2 }
 0x53e   :  { %v488_v8 = vmul.f32 0.5, %v486_v7 }
 0x540   :  { %v489_v9 = vadd.f32 0.5, %v488_v8 }
 0x541   :  { %v496_v3 = vpop.permute.xlu0 %495 }
 0x542   :  { %v498_v4 = vadd.f32 %v496_v3, %v490_v1  ;;  %v729_v3 = vld [vmem:[#allocation2 + $0x14] sm:$0xf] }
 0x544   :  { %1689 = vtanh.f32 %v498_v4 }
 0x54e   :  { %v1690_v5 = vpop.eup %1689 }
 0x54f   :  { %501 = vrot.lane.b32.xlu0 %v1690_v5, %s1768_s1 }
 0x5c1   :  { %v502_v10 = vpop.permute.xlu0 %501 }
 0x5c2   :  { %v504_v11 = vmul.f32 %v502_v10, %v489_v9 }
 0x5c4   :  { %1468 = vmatmul.mubr.msk.f32.vlgmr.msra.gmra.mrb[2].mxu1 %vm281_vm3, %v504_v11 }
 0x5c5   :  { %1593 = vmatpush1.bf16.msra.mxu1 %v1875_v49  ;;  %797 = vmatprep.mubr.f32.mxu1 %v1766_v0 }
 0x5c6   :  { %1595 = vmatprep.subr.bf16.mxu1 %v1877_v50 }
 0x5c9   :  { %1597 = vmatpush1.bf16.msra.mxu1 %v1883_v55 }
 0x5ca   :  { %1599 = vmatprep.subr.bf16.mxu1 %v1886_v56 }
 0x5cd   :  { %1601 = vmatpush1.bf16.msra.mxu1 %v1891_v61 }
 0x5ce   :  { %1603 = vmatprep.subr.bf16.mxu1 %v1894_v62 }
 0x5d1   :  { %1605 = vmatpush1.bf16.msra.mxu1 %v1899_v2 }
 0x5d2   :  { %1623 = vmatprep.subr.bf16.mxu1 %v1873_v45 }
 0x697   :  { %v575_v12 = vpop.f32.mrb[2].mxu1 }
 0x698   :  { %v577_v13 = vpop.f32.mrb[3].mxu1 }
 0x699   :  { %v582_v14 = vcombine.low %v575_v12, %v577_v13 }
 0x69b   :  { %v589_v15 = vrot.slane %v582_v14, %v1867_v25 }
 0x69d   :  { %v591_v17 = vadd.f32 %v589_v15, %v505_v16 }
 0x69f   :  { %1691 = vtanh.f32 %v591_v17 }
 0x6a9   :  { %v1692_v19 = vpop.eup %1691 }
 0x6aa   :  { %596 = vrot.lane.b32.xlu0 %v1692_v19, %s1768_s1  ;;  %v593_v20 = vmul.f32 0.5, %v1692_v19  ;;  %v603_v23 = vrot.slane %v1692_v19, 2 }
 0x6ac   :  { %v594_v22 = vadd.f32 0.5, %v593_v20 }
 0x6ae   :  { %v605_v24 = vmul.f32 %v603_v23, %v594_v22  ;;  %v602_v26 = vmul.f32 %v594_v22, %v498_v4 }
 0x6b0   :  { %607 = vrot.lane.b32.xlu1 %v605_v24, %s1768_s1 }
 0x71c   :  { %v597_v30 = vpop.permute.xlu0 %596 }
 0x71d   :  { %v598_v31 = vrot.slane %v597_v30, 2 }
 0x71f   :  { %v600_v32 = vmul.f32 0.5, %v598_v31 }
 0x721   :  { %v601_v33 = vadd.f32 0.5, %v600_v32 }
 0x722   :  { %v608_v27 = vpop.permute.xlu1 %607 }
 0x723   :  { %v610_v28 = vadd.f32 %v608_v27, %v602_v26 }
 0x725   :  { %1693 = vtanh.f32 %v610_v28 }
 0x72f   :  { %v1694_v29 = vpop.eup %1693 }
 0x730   :  { %613 = vrot.lane.b32.xlu1 %v1694_v29, %s1768_s1 }
 0x7a2   :  { %v614_v34 = vpop.permute.xlu1 %613 }
 0x7a3   :  { %v616_v35 = vmul.f32 %v614_v34, %v601_v33 }
 0x7a5   :  { %1469 = vmatmul.mubr.msk.f32.vlgmr.msra.gmra.mrb[6].mxu0 %vm281_vm3, %v616_v35 }
 0x7a6   :  { %1609 = vmatpush1.bf16.msra.mxu0 %v1875_v49  ;;  %909 = vmatprep.mubr.f32.mxu0 %v1766_v0 }
 0x7a7   :  { %1611 = vmatprep.subr.bf16.mxu0 %v1877_v50 }
 0x7aa   :  { %1613 = vmatpush1.bf16.msra.mxu0 %v1883_v55 }
 0x7ab   :  { %1615 = vmatprep.subr.bf16.mxu0 %v1886_v56 }
 0x7ae   :  { %1617 = vmatpush1.bf16.msra.mxu0 %v1891_v61 }
 0x7af   :  { %1619 = vmatprep.subr.bf16.mxu0 %v1894_v62 }
 0x7b2   :  { %1621 = vmatpush1.bf16.msra.mxu0 %v1899_v2 }
 0x7b3   :  { %1639 = vmatprep.subr.bf16.mxu0 %v1873_v45 }
 0x878   :  { %v687_v36 = vpop.f32.mrb[6].mxu0 }
 0x879   :  { %v689_v37 = vpop.f32.mrb[7].mxu0 }
 0x87a   :  { %v694_v38 = vcombine.low %v687_v36, %v689_v37 }
 0x87c   :  { %v701_v39 = vrot.slane %v694_v38, %v1867_v25 }
 0x87e   :  { %v703_v41 = vadd.f32 %v701_v39, %v617_v40 }
 0x880   :  { %1695 = vtanh.f32 %v703_v41  ;;  %v953_v41 = vld [vmem:[#allocation2 + $0x1c] sm:$0xf] }
 0x88a   :  { %v1696_v42 = vpop.eup %1695 }
 0x88b   :  { %708 = vrot.lane.b32.xlu1 %v1696_v42, %s1768_s1  ;;  %v705_v43 = vmul.f32 0.5, %v1696_v42  ;;  %v715_v46 = vrot.slane %v1696_v42, 2 }
 0x88d   :  { %v706_v44 = vadd.f32 0.5, %v705_v43 }
 0x88f   :  { %v717_v18 = vmul.f32 %v715_v46, %v706_v44  ;;  %v714_v47 = vmul.f32 %v706_v44, %v610_v28 }
 0x891   :  { %719 = vrot.lane.b32.xlu0 %v717_v18, %s1768_s1 }
 0x8fd   :  { %v709_v51 = vpop.permute.xlu1 %708 }
 0x8fe   :  { %v710_v52 = vrot.slane %v709_v51, 2 }
 0x900   :  { %v712_v53 = vmul.f32 0.5, %v710_v52 }
 0x902   :  { %v713_v54 = vadd.f32 0.5, %v712_v53 }
 0x903   :  { %v720_v21 = vpop.permute.xlu0 %719 }
 0x904   :  { %v722_v45 = vadd.f32 %v720_v21, %v714_v47 }
 0x906   :  { %1697 = vtanh.f32 %v722_v45 }
 0x910   :  { %v1698_v48 = vpop.eup %1697 }
 0x911   :  { %725 = vrot.lane.b32.xlu0 %v1698_v48, %s1768_s1 }
 0x983   :  { %v726_v57 = vpop.permute.xlu0 %725 }
 0x984   :  { %v728_v58 = vmul.f32 %v726_v57, %v713_v54 }
 0x986   :  { %1470 = vmatmul.mubr.msk.f32.vlgmr.msra.gmra.mrb[4].mxu1 %vm281_vm3, %v728_v58 }
 0x987   :  { %1625 = vmatpush1.bf16.msra.mxu1 %v1875_v49  ;;  %1021 = vmatprep.mubr.f32.mxu1 %v1766_v0 }
 0x988   :  { %1627 = vmatprep.subr.bf16.mxu1 %v1877_v50 }
 0x98b   :  { %1629 = vmatpush1.bf16.msra.mxu1 %v1883_v55 }
 0x98c   :  { %1631 = vmatprep.subr.bf16.mxu1 %v1886_v56 }
 0x98f   :  { %1633 = vmatpush1.bf16.msra.mxu1 %v1891_v61 }
 0x990   :  { %1635 = vmatprep.subr.bf16.mxu1 %v1894_v62 }
 0x993   :  { %1637 = vmatpush1.bf16.msra.mxu1 %v1899_v2 }
 0xa59   :  { %v799_v59 = vpop.f32.mrb[4].mxu1 }
 0xa5a   :  { %v801_v60 = vpop.f32.mrb[5].mxu1 }
 0xa5b   :  { %v806_v63 = vcombine.low %v799_v59, %v801_v60 }
 0xa5d   :  { %v813_v1 = vrot.slane %v806_v63, %v1867_v25 }
 0xa5f   :  { %v815_v4 = vadd.f32 %v813_v1, %v729_v3 }
 0xa61   :  { %1699 = vtanh.f32 %v815_v4 }
 0xa6b   :  { %v1700_v5 = vpop.eup %1699 }
 0xa6c   :  { %820 = vrot.lane.b32.xlu0 %v1700_v5, %s1768_s1  ;;  %v817_v6 = vmul.f32 0.5, %v1700_v5  ;;  %v827_v8 = vrot.slane %v1700_v5, 2 }
 0xa6e   :  { %v818_v7 = vadd.f32 0.5, %v817_v6 }
 0xa70   :  { %v829_v9 = vmul.f32 %v827_v8, %v818_v7  ;;  %v826_v10 = vmul.f32 %v818_v7, %v722_v45 }
 0xa72   :  { %831 = vrot.lane.b32.xlu1 %v829_v9, %s1768_s1 }
 0xade   :  { %v821_v14 = vpop.permute.xlu0 %820 }
 0xadf   :  { %v822_v15 = vrot.slane %v821_v14, 2  ;;  %v1192_v14 = vld [vmem:[%s2073_s4 + $0x8] sm:$0xff] }
 0xae1   :  { %v824_v16 = vmul.f32 0.5, %v822_v15  ;;  %v1769_v15 = vmov 0.0|0.0  }
 0xae2   :  { %1654 = vmatprep.subr.bf16.mxu1 %v1769_v15 }
 0xae3   :  { %v825_v17 = vadd.f32 0.5, %v824_v16 }
 0xae4   :  { %v832_v11 = vpop.permute.xlu1 %831 }
 0xae5   :  { %v834_v12 = vadd.f32 %v832_v11, %v826_v10 }
 0xae7   :  { %1701 = vtanh.f32 %v834_v12 }
 0xaf1   :  { %v1702_v13 = vpop.eup %1701 }
 0xaf2   :  { %837 = vrot.lane.b32.xlu1 %v1702_v13, %s1768_s1  ;;  %v1191_v13 = vld [vmem:[%s2073_s4] sm:$0xff] }
 0xaf3   :  { %v1655_v16 = vpack.c.bf16 %v1192_v14, %v1191_v13 }
 0xb64   :  { %v838_v19 = vpop.permute.xlu1 %837 }
 0xb65   :  { %v840_v20 = vmul.f32 %v838_v19, %v825_v17 }
 0xb67   :  { %1471 = vmatmul.mubr.msk.f32.vlgmr.msra.gmra.mrb[8].mxu0 %vm281_vm3, %v840_v20 }
 0xb68   :  { %1641 = vmatpush1.bf16.msra.mxu0 %v1875_v49  ;;  %1132 = vmatprep.mubr.f32.mxu0 %v1766_v0  ;;  %v841_v49 = vld [vmem:[#allocation2 + $0x18] sm:$0xf] }
 0xb69   :  { %1643 = vmatprep.subr.bf16.mxu0 %v1877_v50 }
 0xb6c   :  { %1645 = vmatpush1.bf16.msra.mxu0 %v1883_v55 }
 0xb6d   :  { %1647 = vmatprep.subr.bf16.mxu0 %v1886_v56 }
 0xb70   :  { %1649 = vmatpush1.bf16.msra.mxu0 %v1891_v61 }
 0xb71   :  { %1651 = vmatprep.subr.bf16.mxu0 %v1894_v62 }
 0xb74   :  { %1653 = vmatpush1.bf16.msra.mxu0 %v1899_v2 }
 0xb75   :  { %1660 = vmatprep.subr.bf16.mxu0 %v1769_v15 }
 0xc3a   :  { %v911_v22 = vpop.f32.mrb[8].mxu0 }
 0xc3b   :  { %v913_v23 = vpop.f32.mrb[9].mxu0 }
 0xc3c   :  { %v918_v24 = vcombine.low %v911_v22, %v913_v23  ;;  %v1193_v22 = vld [vmem:[%s2073_s4 + $0x10] sm:$0xff]  ;;  %v1194_v23 = vld [vmem:[%s2073_s4 + $0x18] sm:$0xff]  ;;  %s1771_s4 = smov 96  }
 0xc3e   :  { %v925_v26 = vrot.slane %v918_v24, %v1867_v25  ;;  %v1658_v24 = vpack.c.bf16 %v1194_v23, %v1193_v22 }
 0xc40   :  { %v927_v27 = vadd.f32 %v925_v26, %v841_v49  ;;  %v1277_v49 = vld [vmem:[%s2075_s6] sm:$0xff] }
 0xc42   :  { %1703 = vtanh.f32 %v927_v27  ;;  %v1278_v27 = vld [vmem:[%s2075_s6 + $0x8] sm:$0xff] }
 0xc4c   :  { %v1704_v28 = vpop.eup %1703 }
 0xc4d   :  { %932 = vrot.lane.b32.xlu1 %v1704_v28, %s1768_s1  ;;  %v929_v50 = vmul.f32 0.5, %v1704_v28  ;;  %v939_v56 = vrot.slane %v1704_v28, 2  ;;  %v1661_v28 = vpack.c.bf16 %v1278_v27, %v1277_v49 }
 0xc4f   :  { %v930_v55 = vadd.f32 0.5, %v929_v50 }
 0xc51   :  { %v941_v29 = vmul.f32 %v939_v56, %v930_v55  ;;  %v938_v61 = vmul.f32 %v930_v55, %v834_v12 }
 0xc53   :  { %943 = vrot.lane.b32.xlu0 %v941_v29, %s1768_s1 }
 0xcbf   :  { %v933_v31 = vpop.permute.xlu1 %932 }
 0xcc0   :  { %v934_v32 = vrot.slane %v933_v31, 2  ;;  %v1279_v31 = vld [vmem:[%s2075_s6 + $0x10] sm:$0xff] }
 0xcc2   :  { %v936_v33 = vmul.f32 0.5, %v934_v32  ;;  %v1280_v32 = vld [vmem:[%s2075_s6 + $0x18] sm:$0xff] }
 0xcc4   :  { %v937_v34 = vadd.f32 0.5, %v936_v33  ;;  %v1474_v33 = vld [vmem:[%s2074_s5] ss:$0 sm:$0xff] }
 0xcc5   :  { %v944_v62 = vpop.permute.xlu0 %943 }
 0xcc6   :  { %v946_v2 = vadd.f32 %v944_v62, %v938_v61 }
 0xcc8   :  { %1705 = vtanh.f32 %v946_v2 }
 0xcd2   :  { %v1706_v30 = vpop.eup %1705 }
 0xcd3   :  { %949 = vrot.lane.b32.xlu0 %v1706_v30, %s1768_s1 }
 0xd45   :  { %v950_v35 = vpop.permute.xlu0 %949 }
 0xd46   :  { %v952_v36 = vmul.f32 %v950_v35, %v937_v34 }
 0xd48   :  { %1472 = vmatmul.mubr.msk.f32.vlgmr.msra.gmra.mrb[6].mxu1 %vm281_vm3, %v952_v36 }
 0xd49   :  { %1656 = vmatpush3.bf16.msra.mxu1 %v1655_v16  ;;  %1501 = vmatprep.mubr.msk.f32.mxu1 %vm1770_vm4, %v1766_v0 }
 0xd4a   :  { %1657 = vmatprep.subr.bf16.mxu1 %v1769_v15 }
 0xd4d   :  { %1659 = vmatpush3.bf16.msra.mxu1 %v1658_v24 }
 0xd4e   :  { %1666 = vmatprep.subr.bf16.mxu1 %v1769_v15 }
 0xe1b   :  { %v1023_v37 = vpop.f32.mrb[6].mxu1 }
 0xe1c   :  { %v1025_v38 = vpop.f32.mrb[7].mxu1 }
 0xe1d   :  { %v1030_v39 = vcombine.low %v1023_v37, %v1025_v38  ;;  %v1363_v38 = vld [vmem:[%s2077_s8 + $0x8] sm:$0xff] }
 0xe1f   :  { %v1037_v40 = vrot.slane %v1030_v39, %v1867_v25 }
 0xe21   :  { %v1039_v42 = vadd.f32 %v1037_v40, %v953_v41  ;;  %v1476_v40 = vld [vmem:[%s2076_s7] ss:$0 sm:$0xff] }
 0xe23   :  { %1707 = vtanh.f32 %v1039_v42 }
 0xe2d   :  { %v1708_v43 = vpop.eup %1707 }
 0xe2e   :  { %1044 = vrot.lane.b32.xlu0 %v1708_v43, %s1768_s1  ;;  %v1041_v44 = vmul.f32 0.5, %v1708_v43  ;;  %v1051_v18 = vrot.slane %v1708_v43, 2 }
 0xe30   :  { %v1042_v46 = vadd.f32 0.5, %v1041_v44 }
 0xe32   :  { %v1053_v47 = vmul.f32 %v1051_v18, %v1042_v46  ;;  %v1050_v21 = vmul.f32 %v1042_v46, %v946_v2  ;;  %v1478_v46 = vld [vmem:[%s2078_s9] ss:$0 sm:$0xff] }
 0xe34   :  { %1055 = vrot.lane.b32.xlu1 %v1053_v47, %s1768_s1 }
 0xea0   :  { %v1045_v52 = vpop.permute.xlu0 %1044 }
 0xea1   :  { %v1046_v53 = vrot.slane %v1045_v52, 2 }
 0xea3   :  { %v1048_v54 = vmul.f32 0.5, %v1046_v53 }
 0xea5   :  { %v1049_v57 = vadd.f32 0.5, %v1048_v54 }
 0xea6   :  { %v1056_v45 = vpop.permute.xlu1 %1055 }
 0xea7   :  { %v1058_v48 = vadd.f32 %v1056_v45, %v1050_v21 }
 0xea9   :  { %1709 = vtanh.f32 %v1058_v48 }
 0xeb3   :  { %v1710_v51 = vpop.eup %1709 }
 0xeb4   :  { %1061 = vrot.lane.b32.xlu1 %v1710_v51, %s1768_s1 }
 0xf26   :  { %v1062_v58 = vpop.permute.xlu1 %1061 }
 0xf27   :  { %v1064_v59 = vmul.f32 %v1062_v58, %v1049_v57 }
 0xf29   :  { %1473 = vmatmul.mubr.msk.f32.vlgmr.msra.gmra.mrb[10].mxu0 %vm281_vm3, %v1064_v59 }
 0xf2a   :  { %1512 = vmatprep.mubr.msk.f32.mxu0 %vm1770_vm4, %v1766_v0  ;;  %1662 = vmatpush3.bf16.msra.mxu0 %v1661_v28 }
 0xf2b   :  { %1663 = vmatprep.subr.bf16.mxu0 %v1769_v15 }
 0xffc   :  { %v1134_v60 = vpop.f32.mrb[10].mxu0 }
 0xffd   :  { %v1136_v63 = vpop.f32.mrb[11].mxu0 }
 0xffe   :  { %v1141_v1 = vcombine.low %v1134_v60, %v1136_v63 }
0x1000   :  { %v1148_v3 = vrot.slane %v1141_v1, %v1867_v25 }
0x1002   :  { %v1150_v4 = vadd.f32 %v1148_v3, %v953_v41 }
0x1004   :  { %1711 = vtanh.f32 %v1150_v4 }
0x100e   :  { %v1712_v5 = vpop.eup %1711 }
0x100f   :  { %1155 = vrot.lane.b32.xlu1 %v1712_v5, %s1768_s1  ;;  %v1152_v6 = vmul.f32 0.5, %v1712_v5  ;;  %v1162_v8 = vrot.slane %v1712_v5, 2 }
0x1011   :  { %v1153_v7 = vadd.f32 0.5, %v1152_v6 }
0x1013   :  { %v1164_v9 = vmul.f32 %v1162_v8, %v1153_v7  ;;  %v1161_v10 = vmul.f32 %v1153_v7, %v1058_v48 }
0x1015   :  { %1166 = vrot.lane.b32.xlu0 %v1164_v9, %s1768_s1 }
0x1081   :  { %v1156_v19 = vpop.permute.xlu1 %1155 }
0x1082   :  { %v1157_v20 = vrot.slane %v1156_v19, 2 }
0x1084   :  { %v1159_v26 = vmul.f32 0.5, %v1157_v20 }
0x1086   :  { %v1160_v50 = vadd.f32 0.5, %v1159_v26 }
0x1087   :  { %v1167_v11 = vpop.permute.xlu0 %1166 }
0x1088   :  { %v1169_v12 = vadd.f32 %v1167_v11, %v1161_v10 }
0x108a   :  { %1713 = vtanh.f32 %v1169_v12 }
0x1094   :  { %v1714_v17 = vpop.eup %1713 }
0x1095   :  { %1172 = vrot.lane.b32.xlu0 %v1714_v17, %s1768_s1 }
0x1107   :  { %v1173_v55 = vpop.permute.xlu0 %1172 }
0x1108   :  { %v1175_v56 = vmul.f32 %v1173_v55, %v1160_v50 }
0x110a   :  { %v1177_v29 = vcombine.low %v1175_v56, %v1175_v56 }
0x110c   :  { %v1184_v61 = vrot.slane %v1177_v29, %v1867_v25  ;;  %v1664_v25 = vpack.c.bf16 %v1280_v32, %v1279_v31 }
0x110e   :  { %1185 = vrot.lane.b32.xlu1 %v1184_v61, %s1771_s4  ;;  %1665 = vmatpush3.bf16.msra.mxu0 %v1664_v25 }
0x1180   :  { %v1186_v62 = vpop.permute.xlu1 %1185 }
0x1181   :  { %v1189_v2 = vsel %vm1188_vm5, %v1064_v59, %v1186_v62 }
0x1182   :  { %v1190_v30 = vmax.f32 %v1189_v2, 0.0 }
0x1184   :  { %1502 = vmatmul.mubr.msk.f32.vlgmr.msra.gmra.mrb[8].mxu1 %vm1202_vm6, %v1190_v30 }
0x1185   :  { %1519 = vmatprep.mubr.msk.f32.mxu1 %vm1770_vm4, %v1766_v0  ;;  %v1362_v0 = vld [vmem:[%s2077_s8] sm:$0xff]  ;;  %s1737_s8 = scalar_lea.vmem %s1452_s19, 64 }
0x1186   :  { %v1667_v39 = vpack.c.bf16 %v1363_v38, %v1362_v0  ;;  %p1738_p8 = scmp.ne.s32.totalorder %s1452_s19, %s1737_s8  ;;  %p1743_p10 = scmp.lt.s32.totalorder %s1737_s8, %s1737_s8 }
0x1188   :  { %1668 = vmatpush3.bf16.msra.mxu1 %v1667_v39  ;;  %p1744_p11 = por %p1743_p10, %p1742_p9 }
0x118a   :  { %p1745_p12 = pnand %p1744_p11, %p1738_p8 }
0x1257   :  { %v1272_v34 = vpop.f32.mrb[8].mxu1 }
0x1258   :  { %v1273_v35 = vadd.f32 %v1474_v33, %v1272_v34  ;;  %v1503_v36 = vpop.f32.mrb[9].mxu1 }
0x125a   :  { %v1276_v37 = vmax.f32 %v1273_v35, 0.0 }
0x125c   :  { %1513 = vmatmul.mubr.msk.f32.vlgmr.msra.gmra.mrb[12].mxu0 %vm1202_vm6, %v1276_v37 }
0x132f   :  { %v1357_v41 = vpop.f32.mrb[12].mxu0 }
0x1330   :  { %v1358_v42 = vadd.f32 %v1476_v40, %v1357_v41  ;;  %v1514_v43 = vpop.f32.mrb[13].mxu0 }
0x1332   :  { %v1361_v44 = vmax.f32 %v1358_v42, 0.0 }
0x1334   :  { %1520 = vmatmul.mubr.msk.f32.vlgmr.msra.gmra.mrb[10].mxu1 %vm68_vm0, %v1361_v44 }
0x1407   :  { %v1440_v18 = vpop.f32.mrb[10].mxu1 }
0x1408   :  { %v1441_v47 = vadd.f32 %v1478_v46, %v1440_v18  ;;  %v1521_v21 = vpop.f32.mrb[11].mxu1 }
0x140a   :  { %1444 = vst [vmem:[#allocation6] sm:$0xf] %v1441_v47 }
0x140b   :  { %1748 = shalt.err (!%p1745_p12)
}
0x140c   :  { %s1749_s21 = scalar_lea.hbm %s2079_s10, 64 }
0x140d   :  { %p1750_p13 = scmp.ne.s32.totalorder %s2079_s10, %s1749_s21  ;;  %p1753_p0 = scmp.lt.u32.totalorder %s1749_s21, %s2079_s10 }
0x140f   :  { %p1755_p1 = pnand %p1753_p0, %p1750_p13 }
0x1411   :  { %1758 = shalt.err (!%p1755_p1)
}
0x1412   :  { %1454 = dma.vmem_to_hbm [thread:$0]  %s1452_s19, 64, %s2079_s10, [#allocation5]  }
0x1413   :  { %1761 = dma.done.wait [#allocation5], 64  }
0x1414   :  { %1762 = vsyncadd [#allocation5], 4294967232 }
0x1415   :  { %1458 = vsyncpa [#allocation4], 1 }
0x1416   :  { %1459 = vsyncpa [#allocation5], 1 }

</bundles_post_ra>
